<compile_context>
chip_gen: v5e
topology: v5e:2x2
jax: 0.10.0
libtpu: 0.0.40
codegen_flags: <defaults>
</compile_context>

<pallas_src>
import jax
import jax.numpy as jnp
from jax.experimental import pallas as pl
from jax.experimental.pallas import tpu as pltpu

NEG_SLOPE = 0.01       # nn.LeakyReLU default
NORM_EPS = 1e-12       # F.normalize default eps
HEAD_PAD = 128         # fused Task1/Task2 head padded to a full lane width


def _leaky_relu(x):
    return jnp.where(x > 0, x, NEG_SLOPE * x)


# ----------------------------------------------------------------------------- kernel
def encod_kernel(x_ref,
                 w1_ref, b1_ref,
                 w2_ref, b2_ref,
                 w3_ref, b3_ref,
                 wh_ref, bh_ref,
                 out_ref,
                 acc_ref):
    k = pl.program_id(1)

    @pl.when(k == 0)
    def _init():
        acc_ref[...] = jnp.zeros_like(acc_ref)

    # ---- ADDN selection: accumulate the seq-sum in f32 (keep the f32 upcast:
    #      v5e has no bf16 VPU and f32 keeps the normalization accurate; the
    #      VALU has huge slack under the streaming DMA). ----
    acc_ref[...] += jnp.sum(x_ref[...].astype(jnp.float32), axis=1)

    @pl.when(k == pl.num_programs(1) - 1)
    def _finalize():
        v = acc_ref[...]                                        # [TB, V] f32
        sumsq = jnp.sum(v * v, axis=-1, keepdims=True)
        # F.normalize: v / max(||v||, eps) == v * rsqrt(max(sumsq, eps^2))
        v = v * jax.lax.rsqrt(jnp.maximum(sumsq, NORM_EPS * NORM_EPS))

        # ---- Encod_Model.Dense1 (dropout is identity at inference) ----
        h = _leaky_relu(jnp.dot(v.astype(jnp.bfloat16), w1_ref[...],
                                preferred_element_type=jnp.float32) + b1_ref[...])
        h = _leaky_relu(jnp.dot(h.astype(jnp.bfloat16), w2_ref[...],
                                preferred_element_type=jnp.float32) + b2_ref[...])
        h = _leaky_relu(jnp.dot(h.astype(jnp.bfloat16), w3_ref[...],
                                preferred_element_type=jnp.float32) + b3_ref[...])

        # ---- Fused Task1/Task2 head: one MXU push, one lane-dense [TB,128] store ----
        out_ref[...] = (jnp.dot(h.astype(jnp.bfloat16), wh_ref[...],
                                preferred_element_type=jnp.float32) + bh_ref[...])


# ----------------------------------------------------------------------------- tiling
def _vmem_capacity_bytes():
    """Generation-aware VMEM capacity; conservative 64 MiB fallback (fits v7x)."""
    try:
        return int(pltpu.get_tpu_info().vmem_capacity_bytes)
    except Exception:
        return 64 * 1024 * 1024


def _best_divisor(n, limit, align):
    """Largest divisor of n <= limit, preferring multiples of `align` (unless the
    aligned candidate is less than half the best unaligned one)."""
    limit = max(1, min(n, limit))
    best_any, best_aligned = 1, None
    for d in range(1, limit + 1):
        if n % d == 0:
            best_any = d
            if d % align == 0:
                best_aligned = d
    if best_aligned is not None and 2 * best_aligned >= best_any:
        return best_aligned
    return best_any


def _vmem_limit_bytes(tb, ts, vec, hid, mid, x_bytes, weight_bufs, vmem_cap):
    x_buf = 2 * tb * ts * vec * x_bytes                 # double-buffered streamed X
    out_buf = 2 * tb * HEAD_PAD * 4                     # double-buffered f32 out tile
    w_bytes = 2 * (vec * hid + hid * (hid // 2)         # bf16 weights
                   + (hid // 2) * mid + mid * HEAD_PAD)
    b_bytes = 4 * (hid + hid // 2 + mid + HEAD_PAD)     # f32 biases
    acc = tb * vec * 4                                  # scratch accumulator
    est = x_buf + out_buf + weight_bufs * (w_bytes + b_bytes) + acc
    est = (est * 3) // 2 + (4 << 20)                    # headroom for temps/activations
    # v7x (64 MiB VMEM) -> cap ~56 MiB; v5e/v6e (128 MiB) -> cap 100 MiB.
    cap = max(16 << 20, min(vmem_cap - (8 << 20), 100 << 20))
    return int(min(max(est, 16 << 20), cap))


def _auto_tiles(B, S, V, x_bytes, vmem_cap):
    # Batch tile: fill the MXU M dim but leave >=2 batch tiles so the "parallel"
    # grid axis shards across both TensorCores on v7x.
    tb_target = 256 if B > 512 else max(8, B // 2)
    tb = _best_divisor(B, min(256, tb_target), align=8)

    # Seq tile: size the X buffer from the VMEM capacity (~1/8 of VMEM per
    # buffer: 16 MiB on v5e/v6e, 8 MiB on v7x), aligned to 16 rows for dense
    # bf16 sublane packing.
    x_buf_target = min(16 << 20, max(4 << 20, vmem_cap // 8))
    budget_rows = x_buf_target // max(1, tb * V * x_bytes)
    # Fallback fix: if even 16 rows do not fit the budget, shrink tb instead of
    # silently requesting a full-sequence block.
    while budget_rows < 16 and tb > 8 and tb % 2 == 0:
        tb //= 2
        budget_rows = x_buf_target // max(1, tb * V * x_bytes)
    budget_rows = max(16, budget_rows)
    align = 16 if x_bytes == 2 else 8
    ts = _best_divisor(S, budget_rows, align=align)
    return tb, ts


# ----------------------------------------------------------------------------- params
def prepare_params(params):
    """One-time parameter packing (hoisted out of the per-call path):
    bf16 weight casts + fusing the two heads into one lane-dense [mid, 128]
    weight (cols 0:2 = Task1, col 2 = Task2, rest zero) and matching bias."""
    mid = params["w3"].shape[1]
    wh = jnp.zeros((mid, HEAD_PAD), jnp.float32)
    wh = wh.at[:, 0:2].set(params["wt1"]).at[:, 2:3].set(params["wt2"])
    bh = jnp.zeros((1, HEAD_PAD), jnp.float32)
    bh = bh.at[:, 0:2].set(params["bt1"]).at[:, 2:3].set(params["bt2"])
    prep = dict(
        w1=params["w1"].astype(jnp.bfloat16), b1=params["b1"].astype(jnp.float32),
        w2=params["w2"].astype(jnp.bfloat16), b2=params["b2"].astype(jnp.float32),
        w3=params["w3"].astype(jnp.bfloat16), b3=params["b3"].astype(jnp.float32),
        wh=wh.astype(jnp.bfloat16), bh=bh,
    )
    return jax.block_until_ready(prep)


# ----------------------------------------------------------------------------- wrapper
def encod_forward(x, prep, *, tb=None, ts=None, x_dtype=jnp.bfloat16):
    """x: [B, S, V] float (BERT last_hidden_state). prep: prepare_params(...) output.
    Returns (y1, y2). x_dtype=jnp.bfloat16 halves HBM traffic; pass jnp.float32
    to stream the input at full precision."""
    B, S, V = x.shape
    hid = prep["w1"].shape[1]
    mid = prep["w3"].shape[1]
    x_bytes = jnp.dtype(x_dtype).itemsize
    vmem_cap = _vmem_capacity_bytes()

    auto_tb, auto_ts = _auto_tiles(B, S, V, x_bytes, vmem_cap)
    tb = auto_tb if tb is None else tb
    ts = auto_ts if ts is None else ts
    assert B % tb == 0 and S % ts == 0

    xb = x.astype(x_dtype)
    w1, b1 = prep["w1"], prep["b1"]
    w2, b2 = prep["w2"], prep["b2"]
    w3, b3 = prep["w3"], prep["b3"]
    wh, bh = prep["wh"], prep["bh"]

    def build(single_buffer_weights):
        # Constant-index weight/bias blocks: DMA'd once; Buffered(1) avoids
        # allocating a useless second VMEM copy of every weight.
        wkw = dict(pipeline_mode=pl.Buffered(1)) if single_buffer_weights else {}

        def const(shape):
            nd = len(shape)
            return pl.BlockSpec(shape, lambda i, k, _n=nd: (0,) * _n, **wkw)

        weight_bufs = 1 if single_buffer_weights else 2
        return pl.pallas_call(
            encod_kernel,
            out_shape=jax.ShapeDtypeStruct((B, HEAD_PAD), jnp.float32),
            grid_spec=pltpu.PrefetchScalarGridSpec(
                num_scalar_prefetch=0,
                grid=(B // tb, S // ts),
                in_specs=[
                    pl.BlockSpec((tb, ts, V), lambda i, k: (i, k, 0)),   # streamed X
                    const(w1.shape), const(b1.shape),
                    const(w2.shape), const(b2.shape),
                    const(w3.shape), const(b3.shape),
                    const(wh.shape), const(bh.shape),
                ],
                out_specs=pl.BlockSpec((tb, HEAD_PAD), lambda i, k: (i, 0)),
                scratch_shapes=[pltpu.VMEM((tb, V), jnp.float32)],
            ),
            compiler_params=pltpu.CompilerParams(
                dimension_semantics=("parallel", "arbitrary"),
                vmem_limit_bytes=_vmem_limit_bytes(
                    tb, ts, V, hid, mid, x_bytes, weight_bufs, vmem_cap),
            ),
        )

    args = (xb, w1, b1, w2, b2, w3, b3, wh, bh)
    try:
        out = jax.block_until_ready(build(True)(*args))
    except Exception:
        # Fallback for jax builds where pl.Buffered(1) is not accepted by the
        # TPU pipeliner: default double-buffered weights (still correct).
        out = build(False)(*args)

    y1 = out[:, 0:2]       # Task1: Linear(64 -> 2)
    y2 = out[:, 2]         # Task2: Linear(64 -> 1), already squeezed to [B]
    # torch .squeeze(): [B,2] unchanged (B>1), [B,1] -> [B]; handles B==1 too.
    return jnp.squeeze(y1), jnp.squeeze(y2)


# ----------------------------------------------------------------------------- test
def init_params(key, vec_size, hidden_size, mid_size=64):
    """Deterministic synthetic parameters (shapes follow Encod_Model.__init__)."""
    ks = jax.random.split(key, 10)
    h2 = hidden_size // 2

    def lin(kw, kb, fan_in, fan_out):
        w = jax.random.uniform(kw, (fan_in, fan_out), jnp.float32, -0.1, 0.1)
        b = jax.random.uniform(kb, (1, fan_out), jnp.float32, -0.1, 0.1)
        return w, b

    w1, b1 = lin(ks[0], ks[1], vec_size, hidden_size)
    w2, b2 = lin(ks[2], ks[3], hidden_size, h2)
    w3, b3 = lin(ks[4], ks[5], h2, mid_size)
    wt1, bt1 = lin(ks[6], ks[7], mid_size, 2)
    wt2, bt2 = lin(ks[8], ks[9], mid_size, 1)
    return dict(w1=w1, b1=b1, w2=w2, b2=b2, w3=w3, b3=b3,
                wt1=wt1, bt1=bt1, wt2=wt2, bt2=bt2)


def reference_forward(x, p):
    """Pure-JAX f32 reference of the same forward."""
    v = jnp.sum(x, axis=1)
    v = v / jnp.maximum(jnp.linalg.norm(v, axis=-1, keepdims=True), NORM_EPS)
    h = _leaky_relu(v @ p["w1"] + p["b1"])
    h = _leaky_relu(h @ p["w2"] + p["b2"])
    h = _leaky_relu(h @ p["w3"] + p["b3"])
    return jnp.squeeze(h @ p["wt1"] + p["bt1"]), jnp.squeeze(h @ p["wt2"] + p["bt2"])


if __name__ == "__main__":
    # Small shapes consistent with the forward: B=16 sentences, seq=32 tokens,
    # vec_size=128 (BERT hidden stand-in), hidden_size=64 -> mid=64.
    B, S, V, H = 16, 32, 128, 64

    key = jax.random.PRNGKey(0)
    kx, kp = jax.random.split(key)
    x = jax.random.normal(kx, (B, S, V), dtype=jnp.float32)   # BERT last_hidden_state stand-in
    params = init_params(kp, vec_size=V, hidden_size=H)
    prep = prepare_params(params)
    r1, r2 = reference_forward(x, params)

    # 1) Explicit 2x2 grid (tb=8, ts=16): exercises the batch pipeline and the
    #    seq-axis accumulator with a 16-aligned bf16 seq tile.
    y1, y2 = encod_forward(x, prep, tb=8, ts=16)
    jax.block_until_ready((y1, y2))
    assert y1.shape == (B, 2) and y2.shape == (B,)
    assert jnp.allclose(y1, r1, atol=2e-2, rtol=2e-2), "y1 mismatch (explicit tiles)"
    assert jnp.allclose(y2, r2, atol=2e-2, rtol=2e-2), "y2 mismatch (explicit tiles)"

    # 2) Auto tiling path (generation-aware VMEM budget, >=2 batch tiles).
    a1, a2 = encod_forward(x, prep)
    jax.block_until_ready((a1, a2))
    assert jnp.allclose(a1, r1, atol=2e-2, rtol=2e-2), "y1 mismatch (auto tiles)"
    assert jnp.allclose(a2, r2, atol=2e-2, rtol=2e-2), "y2 mismatch (auto tiles)"

    print("KERNEL_OK")
</pallas_src>

<mosaic_0001>
module attributes {stable_mosaic.version = 11 : i64} {
  func.func @encod_kernel(%arg0: i32, %arg1: i32, %arg2: memref<8x16x128xbf16, #tpu.memory_space<vmem>>, %arg3: memref<128x64xbf16, #tpu.memory_space<vmem>>, %arg4: memref<1x64xf32, #tpu.memory_space<vmem>>, %arg5: memref<64x32xbf16, #tpu.memory_space<vmem>>, %arg6: memref<1x32xf32, #tpu.memory_space<vmem>>, %arg7: memref<32x64xbf16, #tpu.memory_space<vmem>>, %arg8: memref<1x64xf32, #tpu.memory_space<vmem>>, %arg9: memref<64x128xbf16, #tpu.memory_space<vmem>>, %arg10: memref<1x128xf32, #tpu.memory_space<vmem>>, %arg11: memref<8x128xf32, #tpu.memory_space<vmem>>, %arg12: memref<8x128xf32, #tpu.memory_space<vmem>>) attributes {dimension_semantics = [#tpu.dimension_semantics<parallel>, #tpu.dimension_semantics<arbitrary>], iteration_bounds = array<i64: 2, 2>, scalar_prefetch = 0 : i64, scratch_operands = 1 : i64, tpu.core_type = #tpu.core_type<tc>, window_params = [{transform_indices = @transform_0, window_bounds = array<i64: 8, 16, 128>}, {pipeline_mode = #tpu.pipeline_mode<synchronous>, transform_indices = @transform_1, window_bounds = array<i64: 128, 64>}, {pipeline_mode = #tpu.pipeline_mode<synchronous>, transform_indices = @transform_2, window_bounds = array<i64: 1, 64>}, {pipeline_mode = #tpu.pipeline_mode<synchronous>, transform_indices = @transform_3, window_bounds = array<i64: 64, 32>}, {pipeline_mode = #tpu.pipeline_mode<synchronous>, transform_indices = @transform_4, window_bounds = array<i64: 1, 32>}, {pipeline_mode = #tpu.pipeline_mode<synchronous>, transform_indices = @transform_5, window_bounds = array<i64: 32, 64>}, {pipeline_mode = #tpu.pipeline_mode<synchronous>, transform_indices = @transform_6, window_bounds = array<i64: 1, 64>}, {pipeline_mode = #tpu.pipeline_mode<synchronous>, transform_indices = @transform_7, window_bounds = array<i64: 64, 128>}, {pipeline_mode = #tpu.pipeline_mode<synchronous>, transform_indices = @transform_8, window_bounds = array<i64: 1, 128>}, {transform_indices = @transform_9, window_bounds = array<i64: 8, 128>}]} {
    %c0_i32 = arith.constant 0 : i32
    %0 = arith.cmpi eq, %arg1, %c0_i32 : i32
    %1 = arith.extui %0 : i1 to i32
    %c0_i32_0 = arith.constant 0 : i32
    %2 = arith.cmpi ne, %1, %c0_i32_0 : i32
    scf.if %2 {
      %cst_8 = arith.constant 0.000000e+00 : f32
      %12 = vector.broadcast %cst_8 : f32 to vector<8x128xf32>
      %c0_9 = arith.constant 0 : index
      %c0_10 = arith.constant 0 : index
      %13 = vector.load %arg12[%c0_9, %c0_10] : memref<8x128xf32, #tpu.memory_space<vmem>>, vector<8x128xf32>
      tpu.vector_store %arg12[%c0_9, %c0_10], %12 {strides = array<i32>} : memref<8x128xf32, #tpu.memory_space<vmem>>, vector<8x128xf32>,
    } else {
    }
    %c0 = arith.constant 0 : index
    %c0_1 = arith.constant 0 : index
    %3 = vector.load %arg12[%c0, %c0_1] : memref<8x128xf32, #tpu.memory_space<vmem>>, vector<8x128xf32>
    %c0_2 = arith.constant 0 : index
    %c0_3 = arith.constant 0 : index
    %c0_4 = arith.constant 0 : index
    %4 = vector.load %arg2[%c0_2, %c0_3, %c0_4] : memref<8x16x128xbf16, #tpu.memory_space<vmem>>, vector<8x16x128xbf16>
    %5 = arith.extf %4 : vector<8x16x128xbf16> to vector<8x16x128xf32>
    %cst = arith.constant dense<0.000000e+00> : vector<8x128xf32>
    %6 = vector.multi_reduction <add>, %5, %cst [1] : vector<8x16x128xf32> to vector<8x128xf32>
    %7 = arith.addf %3, %6 : vector<8x128xf32>
    %c0_5 = arith.constant 0 : index
    %c0_6 = arith.constant 0 : index
    %8 = vector.load %arg12[%c0_5, %c0_6] : memref<8x128xf32, #tpu.memory_space<vmem>>, vector<8x128xf32>
    tpu.vector_store %arg12[%c0_5, %c0_6], %7 {strides = array<i32>} : memref<8x128xf32, #tpu.memory_space<vmem>>, vector<8x128xf32>,
    %c1_i32 = arith.constant 1 : i32
    %9 = arith.cmpi eq, %arg1, %c1_i32 : i32
    %10 = arith.extui %9 : i1 to i32
    %c0_i32_7 = arith.constant 0 : i32
    %11 = arith.cmpi ne, %10, %c0_i32_7 : i32
    scf.if %11 {
      %c0_8 = arith.constant 0 : index
      %c0_9 = arith.constant 0 : index
      %12 = vector.load %arg12[%c0_8, %c0_9] : memref<8x128xf32, #tpu.memory_space<vmem>>, vector<8x128xf32>
      %13 = arith.mulf %12, %12 : vector<8x128xf32>
      %cst_10 = arith.constant dense<0.000000e+00> : vector<8xf32>
      %14 = vector.multi_reduction <add>, %13, %cst_10 [1] : vector<8x128xf32> to vector<8xf32>
      %15 = vector.shape_cast %14 : vector<8xf32> to vector<8x1xf32>
      %cst_11 = arith.constant 1.000000e-24 : f32
      %16 = vector.broadcast %cst_11 : f32 to vector<8x1xf32>
      %17 = arith.maximumf %15, %16 : vector<8x1xf32>
      %18 = math.rsqrt %17 : vector<8x1xf32>
      %19 = vector.broadcast %18 : vector<8x1xf32> to vector<8x128xf32>
      %20 = arith.mulf %12, %19 : vector<8x128xf32>
      %21 = arith.truncf %20 : vector<8x128xf32> to vector<8x128xbf16>
      %c0_12 = arith.constant 0 : index
      %c0_13 = arith.constant 0 : index
      %22 = vector.load %arg3[%c0_12, %c0_13] : memref<128x64xbf16, #tpu.memory_space<vmem>>, vector<128x64xbf16>
      %cst_14 = arith.constant dense<0.000000e+00> : vector<8x64xf32>
      %23 = tpu.matmul %21, %22, %cst_14 {dimension_numbers = #tpu.dot_dimension_numbers<[1], [0], [0], [1], [0, 0, 1, 1], [], []>} : vector<8x128xbf16>, vector<128x64xbf16>, vector<8x64xf32> -> vector<8x64xf32>
      %c0_15 = arith.constant 0 : index
      %c0_16 = arith.constant 0 : index
      %24 = vector.load %arg4[%c0_15, %c0_16] : memref<1x64xf32, #tpu.memory_space<vmem>>, vector<1x64xf32>
      %25 = vector.broadcast %24 : vector<1x64xf32> to vector<8x64xf32>
      %26 = arith.addf %23, %25 : vector<8x64xf32>
      %cst_17 = arith.constant 0.000000e+00 : f32
      %27 = vector.broadcast %cst_17 : f32 to vector<8x64xf32>
      %28 = arith.cmpf ogt, %26, %27 : vector<8x64xf32>
      %cst_18 = arith.constant 0.00999999977 : f32
      %29 = vector.broadcast %cst_18 : f32 to vector<8x64xf32>
      %30 = arith.mulf %29, %26 : vector<8x64xf32>
      %31 = arith.select %28, %26, %30 : vector<8x64xi1>, vector<8x64xf32>
      %32 = arith.truncf %31 : vector<8x64xf32> to vector<8x64xbf16>
      %c0_19 = arith.constant 0 : index
      %c0_20 = arith.constant 0 : index
      %33 = vector.load %arg5[%c0_19, %c0_20] : memref<64x32xbf16, #tpu.memory_space<vmem>>, vector<64x32xbf16>
      %cst_21 = arith.constant dense<0.000000e+00> : vector<8x32xf32>
      %34 = tpu.matmul %32, %33, %cst_21 {dimension_numbers = #tpu.dot_dimension_numbers<[1], [0], [0], [1], [0, 0, 1, 1], [], []>} : vector<8x64xbf16>, vector<64x32xbf16>, vector<8x32xf32> -> vector<8x32xf32>
      %c0_22 = arith.constant 0 : index
      %c0_23 = arith.constant 0 : index
      %35 = vector.load %arg6[%c0_22, %c0_23] : memref<1x32xf32, #tpu.memory_space<vmem>>, vector<1x32xf32>
      %36 = vector.broadcast %35 : vector<1x32xf32> to vector<8x32xf32>
      %37 = arith.addf %34, %36 : vector<8x32xf32>
      %cst_24 = arith.constant 0.000000e+00 : f32
      %38 = vector.broadcast %cst_24 : f32 to vector<8x32xf32>
      %39 = arith.cmpf ogt, %37, %38 : vector<8x32xf32>
      %cst_25 = arith.constant 0.00999999977 : f32
      %40 = vector.broadcast %cst_25 : f32 to vector<8x32xf32>
      %41 = arith.mulf %40, %37 : vector<8x32xf32>
      %42 = arith.select %39, %37, %41 : vector<8x32xi1>, vector<8x32xf32>
      %43 = arith.truncf %42 : vector<8x32xf32> to vector<8x32xbf16>
      %c0_26 = arith.constant 0 : index
      %c0_27 = arith.constant 0 : index
      %44 = vector.load %arg7[%c0_26, %c0_27] : memref<32x64xbf16, #tpu.memory_space<vmem>>, vector<32x64xbf16>
      %cst_28 = arith.constant dense<0.000000e+00> : vector<8x64xf32>
      %45 = tpu.matmul %43, %44, %cst_28 {dimension_numbers = #tpu.dot_dimension_numbers<[1], [0], [0], [1], [0, 0, 1, 1], [], []>} : vector<8x32xbf16>, vector<32x64xbf16>, vector<8x64xf32> -> vector<8x64xf32>
      %c0_29 = arith.constant 0 : index
      %c0_30 = arith.constant 0 : index
      %46 = vector.load %arg8[%c0_29, %c0_30] : memref<1x64xf32, #tpu.memory_space<vmem>>, vector<1x64xf32>
      %47 = vector.broadcast %46 : vector<1x64xf32> to vector<8x64xf32>
      %48 = arith.addf %45, %47 : vector<8x64xf32>
      %cst_31 = arith.constant 0.000000e+00 : f32
      %49 = vector.broadcast %cst_31 : f32 to vector<8x64xf32>
      %50 = arith.cmpf ogt, %48, %49 : vector<8x64xf32>
      %cst_32 = arith.constant 0.00999999977 : f32
      %51 = vector.broadcast %cst_32 : f32 to vector<8x64xf32>
      %52 = arith.mulf %51, %48 : vector<8x64xf32>
      %53 = arith.select %50, %48, %52 : vector<8x64xi1>, vector<8x64xf32>
      %54 = arith.truncf %53 : vector<8x64xf32> to vector<8x64xbf16>
      %c0_33 = arith.constant 0 : index
      %c0_34 = arith.constant 0 : index
      %55 = vector.load %arg9[%c0_33, %c0_34] : memref<64x128xbf16, #tpu.memory_space<vmem>>, vector<64x128xbf16>
      %cst_35 = arith.constant dense<0.000000e+00> : vector<8x128xf32>
      %56 = tpu.matmul %54, %55, %cst_35 {dimension_numbers = #tpu.dot_dimension_numbers<[1], [0], [0], [1], [0, 0, 1, 1], [], []>} : vector<8x64xbf16>, vector<64x128xbf16>, vector<8x128xf32> -> vector<8x128xf32>
      %c0_36 = arith.constant 0 : index
      %c0_37 = arith.constant 0 : index
      %57 = vector.load %arg10[%c0_36, %c0_37] : memref<1x128xf32, #tpu.memory_space<vmem>>, vector<1x128xf32>
      %58 = vector.broadcast %57 : vector<1x128xf32> to vector<8x128xf32>
      %59 = arith.addf %56, %58 : vector<8x128xf32>
      %c0_38 = arith.constant 0 : index
      %c0_39 = arith.constant 0 : index
      %60 = vector.load %arg11[%c0_38, %c0_39] : memref<8x128xf32, #tpu.memory_space<vmem>>, vector<8x128xf32>
      tpu.vector_store %arg11[%c0_38, %c0_39], %59 {strides = array<i32>} : memref<8x128xf32, #tpu.memory_space<vmem>>, vector<8x128xf32>,
    } else {
    }
    return
  }
  func.func @transform_0(%arg0: i32, %arg1: i32) -> (i32, i32, i32) {
    %c0_i32 = arith.constant 0 : i32
    %c0_i32_0 = arith.constant 0 : i32
    return %arg0, %arg1, %c0_i32 : i32, i32, i32
  }
  func.func @transform_1(%arg0: i32, %arg1: i32) -> (i32, i32) {
    %c0_i32 = arith.constant 0 : i32
    %c0_i32_0 = arith.constant 0 : i32
    %c0_i32_1 = arith.constant 0 : i32
    return %c0_i32, %c0_i32_0 : i32, i32
  }
  func.func @transform_2(%arg0: i32, %arg1: i32) -> (i32, i32) {
    %c0_i32 = arith.constant 0 : i32
    %c0_i32_0 = arith.constant 0 : i32
    %c0_i32_1 = arith.constant 0 : i32
    return %c0_i32, %c0_i32_0 : i32, i32
  }
  func.func @transform_3(%arg0: i32, %arg1: i32) -> (i32, i32) {
    %c0_i32 = arith.constant 0 : i32
    %c0_i32_0 = arith.constant 0 : i32
    %c0_i32_1 = arith.constant 0 : i32
    return %c0_i32, %c0_i32_0 : i32, i32
  }
  func.func @transform_4(%arg0: i32, %arg1: i32) -> (i32, i32) {
    %c0_i32 = arith.constant 0 : i32
    %c0_i32_0 = arith.constant 0 : i32
    %c0_i32_1 = arith.constant 0 : i32
    return %c0_i32, %c0_i32_0 : i32, i32
  }
  func.func @transform_5(%arg0: i32, %arg1: i32) -> (i32, i32) {
    %c0_i32 = arith.constant 0 : i32
    %c0_i32_0 = arith.constant 0 : i32
    %c0_i32_1 = arith.constant 0 : i32
    return %c0_i32, %c0_i32_0 : i32, i32
  }
  func.func @transform_6(%arg0: i32, %arg1: i32) -> (i32, i32) {
    %c0_i32 = arith.constant 0 : i32
    %c0_i32_0 = arith.constant 0 : i32
    %c0_i32_1 = arith.constant 0 : i32
    return %c0_i32, %c0_i32_0 : i32, i32
  }
  func.func @transform_7(%arg0: i32, %arg1: i32) -> (i32, i32) {
    %c0_i32 = arith.constant 0 : i32
    %c0_i32_0 = arith.constant 0 : i32
    %c0_i32_1 = arith.constant 0 : i32
    return %c0_i32, %c0_i32_0 : i32, i32
  }
  func.func @transform_8(%arg0: i32, %arg1: i32) -> (i32, i32) {
    %c0_i32 = arith.constant 0 : i32
    %c0_i32_0 = arith.constant 0 : i32
    %c0_i32_1 = arith.constant 0 : i32
    return %c0_i32, %c0_i32_0 : i32, i32
  }
  func.func @transform_9(%arg0: i32, %arg1: i32) -> (i32, i32) {
    %c0_i32 = arith.constant 0 : i32
    %c0_i32_0 = arith.constant 0 : i32
    return %arg0, %c0_i32 : i32, i32
  }
}

module attributes {stable_mosaic.version = 11 : i64} {
  func.func @encod_kernel(%arg0: i32, %arg1: i32, %arg2: memref<8x16x128xbf16, #tpu.memory_space<vmem>>, %arg3: memref<128x64xbf16, #tpu.memory_space<vmem>>, %arg4: memref<1x64xf32, #tpu.memory_space<vmem>>, %arg5: memref<64x32xbf16, #tpu.memory_space<vmem>>, %arg6: memref<1x32xf32, #tpu.memory_space<vmem>>, %arg7: memref<32x64xbf16, #tpu.memory_space<vmem>>, %arg8: memref<1x64xf32, #tpu.memory_space<vmem>>, %arg9: memref<64x128xbf16, #tpu.memory_space<vmem>>, %arg10: memref<1x128xf32, #tpu.memory_space<vmem>>, %arg11: memref<8x128xf32, #tpu.memory_space<vmem>>, %arg12: memref<8x128xf32, #tpu.memory_space<vmem>>) attributes {dimension_semantics = [#tpu.dimension_semantics<parallel>, #tpu.dimension_semantics<arbitrary>], iteration_bounds = array<i64: 2, 2>, scalar_prefetch = 0 : i64, scratch_operands = 1 : i64, tpu.core_type = #tpu.core_type<tc>, window_params = [{transform_indices = @transform_0, window_bounds = array<i64: 8, 16, 128>}, {pipeline_mode = #tpu.pipeline_mode<synchronous>, transform_indices = @transform_1, window_bounds = array<i64: 128, 64>}, {pipeline_mode = #tpu.pipeline_mode<synchronous>, transform_indices = @transform_2, window_bounds = array<i64: 1, 64>}, {pipeline_mode = #tpu.pipeline_mode<synchronous>, transform_indices = @transform_3, window_bounds = array<i64: 64, 32>}, {pipeline_mode = #tpu.pipeline_mode<synchronous>, transform_indices = @transform_4, window_bounds = array<i64: 1, 32>}, {pipeline_mode = #tpu.pipeline_mode<synchronous>, transform_indices = @transform_5, window_bounds = array<i64: 32, 64>}, {pipeline_mode = #tpu.pipeline_mode<synchronous>, transform_indices = @transform_6, window_bounds = array<i64: 1, 64>}, {pipeline_mode = #tpu.pipeline_mode<synchronous>, transform_indices = @transform_7, window_bounds = array<i64: 64, 128>}, {pipeline_mode = #tpu.pipeline_mode<synchronous>, transform_indices = @transform_8, window_bounds = array<i64: 1, 128>}, {transform_indices = @transform_9, window_bounds = array<i64: 8, 128>}]} {
    %c0_i32 = arith.constant 0 : i32
    %0 = arith.cmpi eq, %arg1, %c0_i32 : i32
    %1 = arith.extui %0 : i1 to i32
    %c0_i32_0 = arith.constant 0 : i32
    %2 = arith.cmpi ne, %1, %c0_i32_0 : i32
    scf.if %2 {
      %cst_8 = arith.constant 0.000000e+00 : f32
      %12 = vector.broadcast %cst_8 : f32 to vector<8x128xf32>
      %c0_9 = arith.constant 0 : index
      %c0_10 = arith.constant 0 : index
      %13 = vector.load %arg12[%c0_9, %c0_10] : memref<8x128xf32, #tpu.memory_space<vmem>>, vector<8x128xf32>
      tpu.vector_store %arg12[%c0_9, %c0_10], %12 {strides = array<i32>} : memref<8x128xf32, #tpu.memory_space<vmem>>, vector<8x128xf32>,
    } else {
    }
    %c0 = arith.constant 0 : index
    %c0_1 = arith.constant 0 : index
    %3 = vector.load %arg12[%c0, %c0_1] : memref<8x128xf32, #tpu.memory_space<vmem>>, vector<8x128xf32>
    %c0_2 = arith.constant 0 : index
    %c0_3 = arith.constant 0 : index
    %c0_4 = arith.constant 0 : index
    %4 = vector.load %arg2[%c0_2, %c0_3, %c0_4] : memref<8x16x128xbf16, #tpu.memory_space<vmem>>, vector<8x16x128xbf16>
    %5 = arith.extf %4 : vector<8x16x128xbf16> to vector<8x16x128xf32>
    %cst = arith.constant dense<0.000000e+00> : vector<8x128xf32>
    %6 = vector.multi_reduction <add>, %5, %cst [1] : vector<8x16x128xf32> to vector<8x128xf32>
    %7 = arith.addf %3, %6 : vector<8x128xf32>
    %c0_5 = arith.constant 0 : index
    %c0_6 = arith.constant 0 : index
    %8 = vector.load %arg12[%c0_5, %c0_6] : memref<8x128xf32, #tpu.memory_space<vmem>>, vector<8x128xf32>
    tpu.vector_store %arg12[%c0_5, %c0_6], %7 {strides = array<i32>} : memref<8x128xf32, #tpu.memory_space<vmem>>, vector<8x128xf32>,
    %c1_i32 = arith.constant 1 : i32
    %9 = arith.cmpi eq, %arg1, %c1_i32 : i32
    %10 = arith.extui %9 : i1 to i32
    %c0_i32_7 = arith.constant 0 : i32
    %11 = arith.cmpi ne, %10, %c0_i32_7 : i32
    scf.if %11 {
      %c0_8 = arith.constant 0 : index
      %c0_9 = arith.constant 0 : index
      %12 = vector.load %arg12[%c0_8, %c0_9] : memref<8x128xf32, #tpu.memory_space<vmem>>, vector<8x128xf32>
      %13 = arith.mulf %12, %12 : vector<8x128xf32>
      %cst_10 = arith.constant dense<0.000000e+00> : vector<8xf32>
      %14 = vector.multi_reduction <add>, %13, %cst_10 [1] : vector<8x128xf32> to vector<8xf32>
      %15 = vector.shape_cast %14 : vector<8xf32> to vector<8x1xf32>
      %cst_11 = arith.constant 1.000000e-24 : f32
      %16 = vector.broadcast %cst_11 : f32 to vector<8x1xf32>
      %17 = arith.maximumf %15, %16 : vector<8x1xf32>
      %18 = math.rsqrt %17 : vector<8x1xf32>
      %19 = vector.broadcast %18 : vector<8x1xf32> to vector<8x128xf32>
      %20 = arith.mulf %12, %19 : vector<8x128xf32>
      %21 = arith.truncf %20 : vector<8x128xf32> to vector<8x128xbf16>
      %c0_12 = arith.constant 0 : index
      %c0_13 = arith.constant 0 : index
      %22 = vector.load %arg3[%c0_12, %c0_13] : memref<128x64xbf16, #tpu.memory_space<vmem>>, vector<128x64xbf16>
      %cst_14 = arith.constant dense<0.000000e+00> : vector<8x64xf32>
      %23 = tpu.matmul %21, %22, %cst_14 {dimension_numbers = #tpu.dot_dimension_numbers<[1], [0], [0], [1], [0, 0, 1, 1], [], []>} : vector<8x128xbf16>, vector<128x64xbf16>, vector<8x64xf32> -> vector<8x64xf32>
      %c0_15 = arith.constant 0 : index
      %c0_16 = arith.constant 0 : index
      %24 = vector.load %arg4[%c0_15, %c0_16] : memref<1x64xf32, #tpu.memory_space<vmem>>, vector<1x64xf32>
      %25 = vector.broadcast %24 : vector<1x64xf32> to vector<8x64xf32>
      %26 = arith.addf %23, %25 : vector<8x64xf32>
      %cst_17 = arith.constant 0.000000e+00 : f32
      %27 = vector.broadcast %cst_17 : f32 to vector<8x64xf32>
      %28 = arith.cmpf ogt, %26, %27 : vector<8x64xf32>
      %cst_18 = arith.constant 0.00999999977 : f32
      %29 = vector.broadcast %cst_18 : f32 to vector<8x64xf32>
      %30 = arith.mulf %29, %26 : vector<8x64xf32>
      %31 = arith.select %28, %26, %30 : vector<8x64xi1>, vector<8x64xf32>
      %32 = arith.truncf %31 : vector<8x64xf32> to vector<8x64xbf16>
      %c0_19 = arith.constant 0 : index
      %c0_20 = arith.constant 0 : index
      %33 = vector.load %arg5[%c0_19, %c0_20] : memref<64x32xbf16, #tpu.memory_space<vmem>>, vector<64x32xbf16>
      %cst_21 = arith.constant dense<0.000000e+00> : vector<8x32xf32>
      %34 = tpu.matmul %32, %33, %cst_21 {dimension_numbers = #tpu.dot_dimension_numbers<[1], [0], [0], [1], [0, 0, 1, 1], [], []>} : vector<8x64xbf16>, vector<64x32xbf16>, vector<8x32xf32> -> vector<8x32xf32>
      %c0_22 = arith.constant 0 : index
      %c0_23 = arith.constant 0 : index
      %35 = vector.load %arg6[%c0_22, %c0_23] : memref<1x32xf32, #tpu.memory_space<vmem>>, vector<1x32xf32>
      %36 = vector.broadcast %35 : vector<1x32xf32> to vector<8x32xf32>
      %37 = arith.addf %34, %36 : vector<8x32xf32>
      %cst_24 = arith.constant 0.000000e+00 : f32
      %38 = vector.broadcast %cst_24 : f32 to vector<8x32xf32>
      %39 = arith.cmpf ogt, %37, %38 : vector<8x32xf32>
      %cst_25 = arith.constant 0.00999999977 : f32
      %40 = vector.broadcast %cst_25 : f32 to vector<8x32xf32>
      %41 = arith.mulf %40, %37 : vector<8x32xf32>
      %42 = arith.select %39, %37, %41 : vector<8x32xi1>, vector<8x32xf32>
      %43 = arith.truncf %42 : vector<8x32xf32> to vector<8x32xbf16>
      %c0_26 = arith.constant 0 : index
      %c0_27 = arith.constant 0 : index
      %44 = vector.load %arg7[%c0_26, %c0_27] : memref<32x64xbf16, #tpu.memory_space<vmem>>, vector<32x64xbf16>
      %cst_28 = arith.constant dense<0.000000e+00> : vector<8x64xf32>
      %45 = tpu.matmul %43, %44, %cst_28 {dimension_numbers = #tpu.dot_dimension_numbers<[1], [0], [0], [1], [0, 0, 1, 1], [], []>} : vector<8x32xbf16>, vector<32x64xbf16>, vector<8x64xf32> -> vector<8x64xf32>
      %c0_29 = arith.constant 0 : index
      %c0_30 = arith.constant 0 : index
      %46 = vector.load %arg8[%c0_29, %c0_30] : memref<1x64xf32, #tpu.memory_space<vmem>>, vector<1x64xf32>
      %47 = vector.broadcast %46 : vector<1x64xf32> to vector<8x64xf32>
      %48 = arith.addf %45, %47 : vector<8x64xf32>
      %cst_31 = arith.constant 0.000000e+00 : f32
      %49 = vector.broadcast %cst_31 : f32 to vector<8x64xf32>
      %50 = arith.cmpf ogt, %48, %49 : vector<8x64xf32>
      %cst_32 = arith.constant 0.00999999977 : f32
      %51 = vector.broadcast %cst_32 : f32 to vector<8x64xf32>
      %52 = arith.mulf %51, %48 : vector<8x64xf32>
      %53 = arith.select %50, %48, %52 : vector<8x64xi1>, vector<8x64xf32>
      %54 = arith.truncf %53 : vector<8x64xf32> to vector<8x64xbf16>
      %c0_33 = arith.constant 0 : index
      %c0_34 = arith.constant 0 : index
      %55 = vector.load %arg9[%c0_33, %c0_34] : memref<64x128xbf16, #tpu.memory_space<vmem>>, vector<64x128xbf16>
      %cst_35 = arith.constant dense<0.000000e+00> : vector<8x128xf32>
      %56 = tpu.matmul %54, %55, %cst_35 {dimension_numbers = #tpu.dot_dimension_numbers<[1], [0], [0], [1], [0, 0, 1, 1], [], []>} : vector<8x64xbf16>, vector<64x128xbf16>, vector<8x128xf32> -> vector<8x128xf32>
      %c0_36 = arith.constant 0 : index
      %c0_37 = arith.constant 0 : index
      %57 = vector.load %arg10[%c0_36, %c0_37] : memref<1x128xf32, #tpu.memory_space<vmem>>, vector<1x128xf32>
      %58 = vector.broadcast %57 : vector<1x128xf32> to vector<8x128xf32>
      %59 = arith.addf %56, %58 : vector<8x128xf32>
      %c0_38 = arith.constant 0 : index
      %c0_39 = arith.constant 0 : index
      %60 = vector.load %arg11[%c0_38, %c0_39] : memref<8x128xf32, #tpu.memory_space<vmem>>, vector<8x128xf32>
      tpu.vector_store %arg11[%c0_38, %c0_39], %59 {strides = array<i32>} : memref<8x128xf32, #tpu.memory_space<vmem>>, vector<8x128xf32>,
    } else {
    }
    return
  }
  func.func @transform_0(%arg0: i32, %arg1: i32) -> (i32, i32, i32) {
    %c0_i32 = arith.constant 0 : i32
    %c0_i32_0 = arith.constant 0 : i32
    return %arg0, %arg1, %c0_i32 : i32, i32, i32
  }
  func.func @transform_1(%arg0: i32, %arg1: i32) -> (i32, i32) {
    %c0_i32 = arith.constant 0 : i32
    %c0_i32_0 = arith.constant 0 : i32
    %c0_i32_1 = arith.constant 0 : i32
    return %c0_i32, %c0_i32_0 : i32, i32
  }
  func.func @transform_2(%arg0: i32, %arg1: i32) -> (i32, i32) {
    %c0_i32 = arith.constant 0 : i32
    %c0_i32_0 = arith.constant 0 : i32
    %c0_i32_1 = arith.constant 0 : i32
    return %c0_i32, %c0_i32_0 : i32, i32
  }
  func.func @transform_3(%arg0: i32, %arg1: i32) -> (i32, i32) {
    %c0_i32 = arith.constant 0 : i32
    %c0_i32_0 = arith.constant 0 : i32
    %c0_i32_1 = arith.constant 0 : i32
    return %c0_i32, %c0_i32_0 : i32, i32
  }
  func.func @transform_4(%arg0: i32, %arg1: i32) -> (i32, i32) {
    %c0_i32 = arith.constant 0 : i32
    %c0_i32_0 = arith.constant 0 : i32
    %c0_i32_1 = arith.constant 0 : i32
    return %c0_i32, %c0_i32_0 : i32, i32
  }
  func.func @transform_5(%arg0: i32, %arg1: i32) -> (i32, i32) {
    %c0_i32 = arith.constant 0 : i32
    %c0_i32_0 = arith.constant 0 : i32
    %c0_i32_1 = arith.constant 0 : i32
    return %c0_i32, %c0_i32_0 : i32, i32
  }
  func.func @transform_6(%arg0: i32, %arg1: i32) -> (i32, i32) {
    %c0_i32 = arith.constant 0 : i32
    %c0_i32_0 = arith.constant 0 : i32
    %c0_i32_1 = arith.constant 0 : i32
    return %c0_i32, %c0_i32_0 : i32, i32
  }
  func.func @transform_7(%arg0: i32, %arg1: i32) -> (i32, i32) {
    %c0_i32 = arith.constant 0 : i32
    %c0_i32_0 = arith.constant 0 : i32
    %c0_i32_1 = arith.constant 0 : i32
    return %c0_i32, %c0_i32_0 : i32, i32
  }
  func.func @transform_8(%arg0: i32, %arg1: i32) -> (i32, i32) {
    %c0_i32 = arith.constant 0 : i32
    %c0_i32_0 = arith.constant 0 : i32
    %c0_i32_1 = arith.constant 0 : i32
    return %c0_i32, %c0_i32_0 : i32, i32
  }
  func.func @transform_9(%arg0: i32, %arg1: i32) -> (i32, i32) {
    %c0_i32 = arith.constant 0 : i32
    %c0_i32_0 = arith.constant 0 : i32
    return %arg0, %c0_i32 : i32, i32
  }
}

</mosaic_0001>

<bundles_post_ra>
// kernel: tpu_custom_call.1
= control target key start
LH: loop header
LB: loop body
LE: loop exit
PB: predicated region body
PF: predicated region fallthrough
CT: control target
= control target key end

     0   :  { %s1588_s0 = inlined_call_operand.hbm [shape: bf16[16,32,128], index: 0, kind: input, shape index: {}]   ;;  %s1589_s1 = inlined_call_operand.vmem [shape: bf16[128,64], index: 1, kind: input, shape index: {}]   ;;  %s1590_s2 = inlined_call_operand.vmem [shape: f32[1,64], index: 2, kind: input, shape index: {}]   ;;  %s1591_s3 = inlined_call_operand.vmem [shape: bf16[64,32], index: 3, kind: input, shape index: {}]   ;;  %s1592_s4 = inlined_call_operand.vmem [shape: f32[1,32], index: 4, kind: input, shape index: {}]   ;;  %s1593_s5 = inlined_call_operand.vmem [shape: bf16[32,64], index: 5, kind: input, shape index: {}]   ;;  %s1594_s6 = inlined_call_operand.vmem [shape: f32[1,64], index: 6, kind: input, shape index: {}]   ;;  %s1595_s7 = inlined_call_operand.vmem [shape: bf16[64,128], index: 7, kind: input, shape index: {}]   ;;  %s1596_s8 = inlined_call_operand.vmem [shape: f32[1,128], index: 8, kind: input, shape index: {}]   ;;  %s1597_s9 = inlined_call_operand.hbm [shape: f32[16,128], index: 9, kind: output, shape index: {}]  }
   0x1   :  { %1606 = sst [smem:[#allocation22_spill]] %s1596_s8 }
   0x2   :  { %1607 = sst [smem:[#allocation23_spill]] %s1597_s9 }
   0x3   :  { %14 = vsyncpa [#allocation4], 0 }
   0x4   :  { %16 = vsyncpa [#allocation4 + $0x1], 0 }
   0x5   :  { %17 = vsyncpa [#allocation5], 0 }
   0x6   :  { %19 = vsyncpa [#allocation5 + $0x1], 0  ;;  %s1325_s30 = smov 0   ;;  %s1327_s10 = smov 0  }
   0x7   :  { %s1329_s11 = smov 0   ;;  %s1331_s12 = smov 0  }
   0x8   :  { %s1333_s13 = smov 0   ;;  %s1335_s14 = smov 0  }
   0x9   :  { %s1337_s15 = smov 0   ;;  %s1339_s16 = smov 0  }
   0xa   :  { %s1341_s17 = smov 0   ;;  %s1343_s18 = smov 0  }
   0xb   :  { %s1345_s19 = smov 0  }
   0xc LB: > { %1608 = sst [smem:[#allocation12_spill]] %s1234_s11  ;;  %s874_s20 = sadd.s32 4294967295, %s1266_s19   ;;  %s1266_s19 = sphi %s1345_s19, %s25_s19   ;;  %s1262_s18 = sphi %s1343_s18, %s1633_s18   ;;  %s1258_s17 = sphi %s1341_s17, %s1632_s17   ;;  %s1254_s16 = sphi %s1339_s16, %s1631_s16   ;;  %s1250_s15 = sphi %s1337_s15, %s1630_s15   ;;  %s1246_s14 = sphi %s1335_s14, %s1629_s14   ;;  %s1242_s13 = sphi %s1333_s13, %s1637_s13   ;;  %s1238_s12 = sphi %s1331_s12, %s1636_s12   ;;  %s1234_s11 = sphi %s1329_s11, %s1627_s11   ;;  %s1230_s10 = sphi %s1327_s10, %s1635_s10   ;;  %s1226_s30 = sphi %s1325_s30, %s1634_s30  }
   0xd   : > { %1609 = sst [smem:[#allocation13_spill]] %s1246_s14  ;;  %s875_s21 = sadd.s32 4294967294, %s1266_s19  }
   0xe   : > { %1610 = sst [smem:[#allocation14_spill]] %s1254_s16  ;;  %s34_s22 = sadd.s32 1, %s1258_s17 }
   0xf   : > { %1611 = sst [smem:[#allocation15_spill]] %s1258_s17  ;;  %s37_s23 = sadd.s32 1, %s1262_s18 }
  0x10   : > { %1612 = sst [smem:[#allocation16_spill]] %s1262_s18  ;;  %p35_p0 = scmp.ge.s32.totalorder %s34_s22, 2 }
  0x11   : > { %s46_s24 = sadd.s32 1, %s1246_s14  ;;  %p53_p1 = scmp.ne.s32.totalorder %s1246_s14, %s1242_s13 }
  0x12   : > { %p54_p2 = scmp.eq.s32.totalorder %s1266_s19, 0  ;;  %s1639_s22 = smov (%p35_p0, %s34_s22), 0 }
  0x13   : > { %1613 = sst [smem:[#allocation17_spill]] %s1639_s22  ;;  %s1641_s23 = smov (!%p35_p0, %s37_s23), %s1262_s18 }
  0x14   : > { %s42_s25 = ssub.s32 %s1258_s17, %s1639_s22  ;;  %p1391_p3 = por %p54_p2, %p53_p1 }
  0x15   : > { %p39_p4 = scmp.ge.s32.totalorder %s1641_s23, 2  ;;  %p59_p5 = scmp.ne.s32.totalorder %s1242_s13, %s1238_s12 }
  0x16   : > { %p60_p6 = scmp.eq.s32.totalorder %s874_s20, 0  ;;  %s240_s27 = sadd.s32 1, %s1234_s11 }
  0x17   : > { %s1643_s23 = smov (%p39_p4, %s1641_s23), 0  ;;  %p250_p8 = scmp.ne.s32.totalorder %s1234_s11, %s1230_s10 }
  0x18   : > { %1615 = sst [smem:[#allocation18_spill]] %s1643_s23  ;;  %p1399_p7 = por %p60_p6, %p59_p5 }
  0x19   : > { %s41_s29 = ssub.s32 %s1262_s18, %s1643_s23  ;;  %p251_p9 = scmp.eq.s32.totalorder %s874_s20, 3 }
  0x1a   : > { %s43_s22 = sor.u32 %s42_s25, %s41_s29  ;;  %p238_p10 = scmp.eq.s32.totalorder %s41_s29, 0 }
  0x1b   : > { %p44_p11 = scmp.eq.s32.totalorder %s43_s22, 0  ;;  %p1407_p12 = por %p251_p9, %p250_p8 }
  0x1c   : > { %s1412_s12 = scalar_select %p238_p10, %s1234_s11, %s240_s27  }
  0x1d   : > { %s1415_s16 = scalar_select %p44_p11, %s1246_s14, %s46_s24  }
  0x1e   : > { %1618 = sst [smem:[#allocation19_spill]] %s1412_s12  ;;  %p256_p13 = scmp.ne.s32.totalorder %s1230_s10, %s1226_s30 }
  0x1f   : > { %1619 = sst [smem:[#allocation20_spill]] %s1415_s16  ;;  %p257_p0 = scmp.eq.s32.totalorder %s875_s21, 3 }
  0x20   : > { %p877_p2 = scmp.ge.s32.totalorder %s1266_s19, 4 }
  0x21   : > { %p1419_p1 = por %p257_p0, %p256_p13 }
  0x22   : > { %297 = sbr.rel (%p877_p2) target bundleno = 55 (0x37), region = 48 }
  0x23   : > { %s1620_s8 = scalar_select %p1419_p1, 1, 0 }
  0x25   : > { %1621 = sst [smem:[#allocation21_spill]] %s1620_s8 }
  0x27   : > { %s301_s20 = sand.u32 1, %s1246_s14   ;;  %s880_s22 = sshll.u32 %s1258_s17, 1 }
  0x28   : > { %s878_s25 = sshll.u32 %s301_s20, 6  ;;  %s969_s24 = sshll.u32 %s1262_s18, 5 }
  0x29   : > { %s311_s27 = sadd.s32 %s969_s24, %s880_s22  ;;  %s305_s29 = scalar_lea.vmem [#allocation3], %s878_s25 }
  0x2a   : > { %s882_s21 = sshll.u32 %s311_s27, 2  ;;  %s328_s23 = sshll.u32 %s305_s29, 4  ;;  %s329_s23 = int_to_ptr.vmem [resolvable:$true] %s328_s23 }
  0x2b   : > { %s313_s11 = scalar_lea.hbm %s1588_s0, %s882_s21  ;;  %s1268_s14 = smov 256  }
  0x2c   : > { %s1027_s8 = scalar_select %p1391_p3, [#allocation0], [#allocation9] }
  0x2d   : > { %1028 = sst [smem:[#allocation8]] (%p1391_p3), %s1268_s14  ;;  %s326_s18 = sshll.u32 %s313_s11, 4  ;;  %s327_s18 = int_to_ptr.hbm [resolvable:$true] %s326_s18 }
  0x2e   : > { %s318_s17 = sld [smem:[%s1027_s8]]   ;;  %s1269_s22 = smov 128  }
  0x2f   : > { %1029 = sst [smem:[#allocation8 + $0x1]] (%p1391_p3), %s1269_s22  ;;  %s1270_s25 = smov 2  }
  0x30   : > { %1030 = sst [smem:[#allocation8 + $0x2]] (%p1391_p3), %s1270_s25  ;;  %s1271_s24 = smov 64  }
  0x31   : > { %1031 = sst [smem:[#allocation8 + $0x3]] (%p1391_p3), %s1271_s24  ;;  %s1272_s12 = smov 4  }
  0x32   : > { %1032 = sst [smem:[#allocation8 + $0x4]] (%p1391_p3), %s1271_s24  ;;  %s302_s8 = scalar_lea.sflag [#allocation4], %s301_s20 }
  0x33   : > { %1033 = sst [smem:[#allocation8 + $0x5]] (%p1391_p3), %s1272_s12  ;;  %s1273_s27 = smov [#allocation7]  }
  0x34   : > { %s883_s16 = sshll.u32 %s318_s17, 26 }
  0x35   : > { %s884_s14 = sadd.s32 134217728, %s883_s16 }
  0x36   : > { %1034 = dma.general (%p1391_p3), %s327_s18, 1024, %s329_s23, %s302_s8, %s1273_s27, [#allocation8], %s884_s14, 0  }
  0x37 PF: > { %p885_p4 = scmp.ge.s32.totalorder %s1266_s19, 1  ;;  %p349_p5 = scmp.lt.s32.totalorder %s1266_s19, 5 }
  0x39   : > { %p350_p6 = pnand %p885_p4, %p349_p5 }
  0x3a   : > { %s355_s11 = sand.u32 (!%p350_p6), 1, %s1242_s13  }
  0x3b   : > { %353 = sbr.rel (%p350_p6) target bundleno = 818 (0x332), region = 56  ;;  %s886_s21 = sshll.u32 (!%p350_p6), %s355_s11, 6 }
  0x3c   : > { %s356_s17 = scalar_lea.sflag (!%p350_p6), [#allocation4], %s355_s11  ;;  %s359_s29 = scalar_lea.vmem (!%p350_p6), [#allocation3], %s886_s21 }
  0x40   : > { %1217 = dma.done.wait (%p1399_p7), %s356_s17, 1024  }
  0x41   : > { %1219 = vsyncadd (%p1399_p7), %s356_s17, 4294966272  ;;  %s392_s18 = sand.u32 1, %s1230_s10   ;;  %p888_p3 = scmp.ne.s32.totalorder %s1250_s15, 0 }
  0x42   : > { %s1456_s23 = sshll.u32 %s392_s18, 3 }
  0x43   : > { %s394_s26 = scalar_lea.vmem [#allocation6], %s1456_s23  ;;  %401 = sbr.rel (%p888_p3) target bundleno = 74 (0x4a), region = 64 }
  0x48   : > { %v1274_v0 = vmov 0.0  }
  0x49   : > { %402 = vst [vmem:[#allocation2] sm:$0xff] %v1274_v0 }
  0x4a PF: > { %v989_v1 = vld [vmem:[%s359_s29] sm:$0xff]   ;;  %v1020_v2 = vld [vmem:[%s359_s29 + $0x8] sm:$0xff]   ;;  %v1021_v7 = vld [vmem:[%s359_s29 + $0x10] sm:$0xff]   ;;  %vm500_vm0 = vcmask 1041409   ;;  %vm502_vm1 = vcmask 1042434   ;;  %vm504_vm2 = vcmask 1043459  }
  0x4b   : > { %v990_v3 = vunpack.c.l.bf16 %v989_v1  ;;  %v991_v4 = vunpack.c.h.bf16 %v989_v1  ;;  %v994_v5 = vunpack.c.l.bf16 %v1020_v2  ;;  %v995_v6 = vunpack.c.h.bf16 %v1020_v2  ;;  %v1022_v8 = vld [vmem:[%s359_s29 + $0x18] sm:$0xff]   ;;  %v1023_v9 = vld [vmem:[%s359_s29 + $0x20] sm:$0xff]   ;;  %v1024_v14 = vld [vmem:[%s359_s29 + $0x28] sm:$0xff]   ;;  %p889_p7 = scmp.ne.s32.totalorder %s1250_s15, 1 }
  0x4c   : > { %v998_v10 = vunpack.c.l.bf16 %v1021_v7  ;;  %v999_v11 = vunpack.c.h.bf16 %v1021_v7  ;;  %v1002_v12 = vunpack.c.l.bf16 %v1022_v8  ;;  %v1003_v13 = vunpack.c.h.bf16 %v1022_v8  ;;  %v1025_v15 = vld [vmem:[%s359_s29 + $0x30] sm:$0xff]   ;;  %v1026_v16 = vld [vmem:[%s359_s29 + $0x38] sm:$0xff]   ;;  %s1622_s29 = sld [smem:[#allocation22_spill]] (!%p889_p7) }
  0x4d   : > { %v1006_v17 = vunpack.c.l.bf16 %v1023_v9  ;;  %v1007_v18 = vunpack.c.h.bf16 %v1023_v9  ;;  %v1010_v19 = vunpack.c.l.bf16 %v1024_v14  ;;  %v1011_v20 = vunpack.c.h.bf16 %v1024_v14 }
  0x4e   : > { %v1014_v21 = vunpack.c.l.bf16 %v1025_v15  ;;  %v1015_v22 = vunpack.c.h.bf16 %v1025_v15  ;;  %v1018_v23 = vunpack.c.l.bf16 %v1026_v16  ;;  %v1019_v24 = vunpack.c.h.bf16 %v1026_v16 }
  0x4f   : > { %v436_v25 = vadd.f32 %v991_v4, %v990_v3  ;;  %v443_v26 = vadd.f32 %v995_v6, %v994_v5  ;;  %v450_v27 = vadd.f32 %v999_v11, %v998_v10  ;;  %v457_v28 = vadd.f32 %v1003_v13, %v1002_v12 }
  0x50   : > { %v464_v29 = vadd.f32 %v1007_v18, %v1006_v17  ;;  %v471_v30 = vadd.f32 %v1011_v20, %v1010_v19  ;;  %v478_v31 = vadd.f32 %v1015_v22, %v1014_v21  ;;  %v485_v32 = vadd.f32 %v1019_v24, %v1018_v23  ;;  %v403_v21 = vld [vmem:[#allocation2] sm:$0xff] }
  0x51   : > { %v437_v33 = vrot.slane %v436_v25, 4  ;;  %v444_v34 = vrot.slane %v443_v26, 4  ;;  %v451_v35 = vrot.slane %v450_v27, 4  ;;  %v458_v36 = vrot.slane %v457_v28, 4 }
  0x52   : > { %v465_v37 = vrot.slane %v464_v29, 4  ;;  %v472_v38 = vrot.slane %v471_v30, 4  ;;  %v479_v39 = vrot.slane %v478_v31, 4  ;;  %v486_v40 = vrot.slane %v485_v32, 4 }
  0x53   : > { %v438_v41 = vadd.f32 %v437_v33, %v436_v25  ;;  %v445_v42 = vadd.f32 %v444_v34, %v443_v26  ;;  %v452_v43 = vadd.f32 %v451_v35, %v450_v27  ;;  %v459_v44 = vadd.f32 %v458_v36, %v457_v28 }
  0x54   : > { %v466_v45 = vadd.f32 %v465_v37, %v464_v29  ;;  %v473_v46 = vadd.f32 %v472_v38, %v471_v30  ;;  %v480_v47 = vadd.f32 %v479_v39, %v478_v31  ;;  %v487_v48 = vadd.f32 %v486_v40, %v485_v32 }
  0x55   : > { %v439_v49 = vrot.slane %v438_v41, 2  ;;  %v446_v50 = vrot.slane %v445_v42, 2  ;;  %v453_v51 = vrot.slane %v452_v43, 2  ;;  %v460_v52 = vrot.slane %v459_v44, 2 }
  0x56   : > { %v467_v53 = vrot.slane %v466_v45, 2  ;;  %v474_v54 = vrot.slane %v473_v46, 2  ;;  %v481_v55 = vrot.slane %v480_v47, 2  ;;  %v488_v56 = vrot.slane %v487_v48, 2 }
  0x57   : > { %v440_v57 = vadd.f32 %v439_v49, %v438_v41  ;;  %v447_v58 = vadd.f32 %v446_v50, %v445_v42  ;;  %v454_v59 = vadd.f32 %v453_v51, %v452_v43  ;;  %v461_v60 = vadd.f32 %v460_v52, %v459_v44 }
  0x58   : > { %v468_v61 = vadd.f32 %v467_v53, %v466_v45  ;;  %v475_v62 = vadd.f32 %v474_v54, %v473_v46  ;;  %v482_v63 = vadd.f32 %v481_v55, %v480_v47  ;;  %v489_v0 = vadd.f32 %v488_v56, %v487_v48 }
  0x59   : > { %v441_v1 = vrot.slane %v440_v57, 1  ;;  %v448_v2 = vrot.slane %v447_v58, 1  ;;  %v455_v3 = vrot.slane %v454_v59, 1  ;;  %v462_v4 = vrot.slane %v461_v60, 1 }
  0x5a   : > { %v469_v5 = vrot.slane %v468_v61, 1  ;;  %v476_v6 = vrot.slane %v475_v62, 1  ;;  %v483_v7 = vrot.slane %v482_v63, 1  ;;  %v490_v8 = vrot.slane %v489_v0, 1 }
  0x5b   : > { %v442_v9 = vadd.f32 %v441_v1, %v440_v57  ;;  %v449_v10 = vadd.f32 %v448_v2, %v447_v58  ;;  %v456_v11 = vadd.f32 %v455_v3, %v454_v59  ;;  %v463_v12 = vadd.f32 %v462_v4, %v461_v60 }
  0x5c   : > { %v470_v13 = vadd.f32 %v469_v5, %v468_v61  ;;  %v477_v14 = vadd.f32 %v476_v6, %v475_v62  ;;  %vm506_vm3 = vcmask 1044484   ;;  %v484_v16 = vadd.f32 %v483_v7, %v482_v63 }
  0x5d   : > { %v501_v15 = vsel %vm500_vm0, %v449_v10, %v442_v9  ;;  %vm508_vm4 = vcmask 1045509   ;;  %v491_v18 = vadd.f32 %v490_v8, %v489_v0  ;;  %vm510_vm5 = vcmask 1046534  }
  0x5e   : > { %v503_v17 = vsel %vm502_vm1, %v456_v11, %v501_v15  ;;  %vm512_vm6 = vcmask 1047559  }
  0x5f   : > { %v505_v19 = vsel %vm504_vm2, %v463_v12, %v503_v17 }
  0x60   : > { %v507_v20 = vsel %vm506_vm3, %v470_v13, %v505_v19 }
  0x61   : > { %v509_v22 = vsel %vm508_vm4, %v477_v14, %v507_v20 }
  0x62   : > { %v511_v23 = vsel %vm510_vm5, %v484_v16, %v509_v22  ;;  %520 = sbr.rel (%p889_p7) target bundleno = 797 (0x31d), region = 68 }
  0x63   : > { %v513_v24 = vsel %vm512_vm6, %v491_v18, %v511_v23 }
  0x64   : > { %v515_v25 = vadd.f32 %v513_v24, %v403_v21 }
  0x66   : > { %516 = vst [vmem:[#allocation2] sm:$0xff] %v515_v25 }
  0x67   : > { %v977_v27 = vld [vmem:[%s1589_s1 + $0x38] sm:$0xff]  ;;  %v976_v29 = vld [vmem:[%s1589_s1 + $0x30] sm:$0xff]  ;;  %v975_v30 = vld [vmem:[%s1589_s1 + $0x28] sm:$0xff]  ;;  %vm659_vm11 = vcmask 523264   ;;  %vm700_vm13 = vcmask 261120  }
  0x68   : > { %606 = vmatpush.bf16.msra.mxu0 %v977_v27  ;;  %v974_v31 = vld [vmem:[%s1589_s1 + $0x20] sm:$0xff]  ;;  %v973_v32 = vld [vmem:[%s1589_s1 + $0x18] sm:$0xff]  ;;  %v972_v33 = vld [vmem:[%s1589_s1 + $0x10] sm:$0xff] }
  0x69   : > { %v971_v34 = vld [vmem:[%s1589_s1 + $0x8] sm:$0xff]  ;;  %v970_v35 = vld [vmem:[%s1589_s1] sm:$0xff]  ;;  %v981_v36 = vld [vmem:[%s1591_s3 + $0x18] sm:$0xff] }
  0x6a   : > { %667 = vmatpush.bf16.msra.mxu1 %v981_v36  ;;  %v980_v37 = vld [vmem:[%s1591_s3 + $0x10] sm:$0xff]  ;;  %v979_v49 = vld [vmem:[%s1591_s3 + $0x8] sm:$0xff]  ;;  %v978_v50 = vld [vmem:[%s1591_s3] sm:$0xff] }
  0x6b   : > { %v1138_v51 = vld [vmem:[%s1590_s2] ss:$0 sm:$0xff]  ;;  %v983_v58 = vld [vmem:[%s1593_s5 + $0x8] sm:$0xff]  ;;  %v987_v60 = vld [vmem:[%s1595_s7 + $0x18] sm:$0xff] }
  0x6c   : > { %607 = vmatpush.bf16.msra.mxu0 %v976_v29  ;;  %710 = vmatpush.bf16.msra.mxu2 %v983_v58  ;;  %v982_v59 = vld [vmem:[%s1593_s5] sm:$0xff]  ;;  %v986_v61 = vld [vmem:[%s1595_s7 + $0x10] sm:$0xff]  ;;  %v985_v5 = vld [vmem:[%s1595_s7 + $0x8] sm:$0xff] }
  0x6d   : > { %v521_v26 = vld [vmem:[#allocation2] sm:$0xff]  ;;  %764 = vmatpush.bf16.msra.mxu3 %v987_v60 }
  0x6e   : > { %v522_v28 = vmul.f32 %v521_v26, %v521_v26  ;;  %668 = vmatpush.bf16.msra.mxu1 %v980_v37  ;;  %v1139_v62 = vld [vmem:[%s1592_s4] ss:$0 sm:$0xff] }
  0x6f   : > { %v984_v6 = vld [vmem:[%s1595_s7] sm:$0xff] }
  0x70   : > { %523 = vadd.xlane.f32.xlu0 %v522_v28  ;;  %608 = vmatpush.bf16.msra.mxu0 %v975_v30  ;;  %v1140_v7 = vld [vmem:[%s1594_s6] ss:$0 sm:$0xff] }
  0x71   : > { %711 = vmatpush.bf16.msra.mxu2 %v982_v59  ;;  %765 = vmatpush.bf16.msra.mxu3 %v986_v61  ;;  %v1141_v14 = vld [vmem:[%s1622_s29] ss:$0 sm:$0xff] }
  0x72   : > { %669 = vmatpush.bf16.msra.mxu1 %v979_v49 }
  0x74   : > { %609 = vmatpush.bf16.msra.mxu0 %v974_v31 }
  0x75   : > { %766 = vmatpush.bf16.msra.mxu3 %v985_v5 }
  0x76   : > { %670 = vmatpush.bf16.msra.mxu1 %v978_v50 }
  0x78   : > { %610 = vmatpush.bf16.msra.mxu0 %v973_v32 }
  0x79   : > { %767 = vmatpush.bf16.msra.mxu3 %v984_v6 }
  0x7c   : > { %611 = vmatpush.bf16.msra.mxu0 %v972_v33 }
  0x80   : > { %612 = vmatpush.bf16.msra.mxu0 %v971_v34 }
  0x84   : > { %613 = vmatpush.bf16.msra.mxu0 %v970_v35 }
  0xe3   : > { %v524_v38 = vpop.xlane.xlu0 %523 }
  0xe4   : > { %v525_v39 = vmax.f32 %v524_v38, 1e-24 }
  0xe6   : > { %1142 = vrsqrt.f32 %v525_v39  ;;  %vm532_vm8 = vweird.f32 %v525_v39 }
  0xec   : > { %v1143_v40 = vpop.eup %1142 }
  0xed   : > { %v527_v41 = vmul.f32 %v1143_v40, %v525_v39  ;;  %vm533_vm7 = vweird.f32 %v1143_v40 }
  0xee   : > { %vm534_vm9 = vmor %vm532_vm8, %vm533_vm7 }
  0xef   : > { %v528_v42 = vmul.f32 %v1143_v40, %v527_v41 }
  0xf1   : > { %v529_v43 = vmul.f32 0.5, %v528_v42 }
  0xf3   : > { %v530_v44 = vsub.f32 1.5, %v529_v43 }
  0xf5   : > { %v531_v45 = vmul.f32 %v1143_v40, %v530_v44 }
  0xf7   : > { %v535_v46 = vsel %vm534_vm9, %v1143_v40, %v531_v45 }
  0xf8   : > { %v536_v47 = vmul.f32 %v535_v46, %v521_v26 }
  0xfa   : > { %v537_v48 = vpack.c.bf16 %v536_v47, %v536_v47 }
  0xfc   : > { %614 = vmatmul.bf16.vlgmr.msra.gmra.mxu0 %v537_v48 }
 0x179   : > { %v615_v52 = vpop.f32.mrf.mxu0 }
 0x17a   : > { %v616_v53 = vadd.f32 %v1138_v51, %v615_v52 }
 0x17c   : > { %vm619_vm10 = vcmp.gt.f32.partialorder %v616_v53, 0.0  ;;  %v620_v54 = vmul.f32 0.01, %v616_v53 }
 0x17e   : > { %v621_v55 = vsel %vm619_vm10, %v616_v53, %v620_v54 }
 0x17f   : > { %v622_v56 = vpack.c.bf16 %v621_v55, %v621_v55 }
 0x181   : > { %v617_v57 = vpop.f32.mrf.mxu0  ;;  %938 = vmatmul.msk.bf16.vlgmr.msra.gmra.mxu1 %vm659_vm11, %v622_v56 }
 0x1fe   : > { %v672_v63 = vpop.f32.mrf.mxu1 }
 0x1ff   : > { %v673_v0 = vadd.f32 %v1139_v62, %v672_v63 }
 0x201   : > { %vm676_vm12 = vcmp.gt.f32.partialorder %v673_v0, 0.0  ;;  %v677_v1 = vmul.f32 0.01, %v673_v0 }
 0x203   : > { %v678_v2 = vsel %vm676_vm12, %v673_v0, %v677_v1 }
 0x204   : > { %v679_v3 = vpack.c.bf16 %v678_v2, %v678_v2 }
 0x206   : > { %v674_v4 = vpop.f32.mrf.mxu1  ;;  %947 = vmatmul.msk.bf16.vlgmr.msra.gmra.mxu2 %vm700_vm13, %v679_v3 }
 0x289   : > { %v713_v8 = vpop.f32.mrf.mxu2 }
 0x28a   : > { %v714_v9 = vadd.f32 %v1140_v7, %v713_v8 }
 0x28c   : > { %vm717_vm14 = vcmp.gt.f32.partialorder %v714_v9, 0.0  ;;  %v718_v10 = vmul.f32 0.01, %v714_v9 }
 0x28e   : > { %v719_v11 = vsel %vm717_vm14, %v714_v9, %v718_v10 }
 0x28f   : > { %v720_v12 = vpack.c.bf16 %v719_v11, %v719_v11 }
 0x291   : > { %v715_v13 = vpop.f32.mrf.mxu2  ;;  %964 = vmatmul.msk.bf16.vlgmr.msra.gmra.mxu3 %vm659_vm11, %v720_v12 }
 0x314   : > { %v769_v15 = vpop.f32.mrf.mxu3 }
 0x315   : > { %v770_v16 = vadd.f32 %v1141_v14, %v769_v15 }
 0x317   : > { %773 = vst [vmem:[%s394_s26] sm:$0xff] %v770_v16 }
 0x31c   : > { %v771_v17 = vpop.f32.mrf.mxu3 }
 0x31d PF: > { %s1623_s28 = sld [smem:[#allocation14_spill]]  ;;  %s787_s15 = sshll.u32 %s394_s26, 4  ;;  %s788_s15 = int_to_ptr.vmem [resolvable:$true] %s787_s15 }
 0x31e   : > { %s1624_s24 = sld [smem:[#allocation23_spill]]  ;;  %s775_s14 = scalar_lea.sflag [#allocation5], %s392_s18 }
 0x323   : > { %s966_s20 = sshll.u32 %s1623_s28, 3 }
 0x324   : > { %s785_s16 = scalar_lea.hbm %s1624_s24, %s966_s20  ;;  %s1164_s17 = scalar_lea.hbm %s1624_s24, 16 }
 0x325   : > { %s789_s12 = sshll.u32 %s785_s16, 4  ;;  %s790_s12 = int_to_ptr.hbm [resolvable:$true] %s789_s12 }
 0x326   : > { %s1158_s8 = sshra.s32 %s790_s12, 4  ;;  %s1159_s8 = int_to_ptr.hbm [resolvable:$true] %s1158_s8 }
 0x327   : > { %s1160_s27 = scalar_lea.hbm %s1159_s8, 8  ;;  %p1165_p11 = scmp.lt.s32.totalorder %s1159_s8, %s1624_s24 }
 0x328   : > { %p1161_p8 = scmp.ne.s32.totalorder %s1159_s8, %s1160_s27  ;;  %p1166_p13 = scmp.lt.s32.totalorder %s1164_s17, %s1160_s27 }
 0x32a   : > { %p1162_p9 = pnand %p1161_p8, %p1407_p12  ;;  %p1167_p0 = por %p1166_p13, %p1165_p11 }
 0x32c   : > { %p1163_p10 = pneg %p1162_p9 }
 0x32e   : > { %p1168_p2 = pnand %p1167_p0, %p1163_p10 }
 0x330   : > { %1171 = shalt.err (!%p1168_p2)
}
 0x331   : > { %1036 = dma.vmem_to_hbm [thread:$0]  (%p1407_p12), %s788_s15, 128, %s790_s12, %s775_s14  }
 0x332 PF: > { %p1042_p4 = scmp.ge.s32.totalorder %s1266_s19, 2  ;;  %s801_s23 = sand.u32 1, %s1226_s30  }
 0x333   : > { %s802_s26 = scalar_lea.sflag [#allocation5], %s801_s23 }
 0x334   : > { %p1039_p5 = pnand %p1042_p4, %p1419_p1 }
 0x336   : > { %p1040_p6 = pneg %p1039_p5 }
 0x338   : > { %1221 = dma.done.wait (%p1040_p6), %s802_s26, 128  }
 0x339   : > { %1223 = vsyncadd (%p1040_p6), %s802_s26, 4294967168  ;;  %s25_s19 = sadd.s32 1, %s1266_s19   ;;  %s1626_s20 = sld [smem:[#allocation12_spill]] }
 0x33a   : > { %p22_p3 = scmp.ge.s32.totalorder %s25_s19, 6   ;;  %s1627_s11 = sld [smem:[#allocation19_spill]] }
 0x33b   : > { %s1628_s9 = sld [smem:[#allocation13_spill]]  ;;  %s1634_s30 = smov %s1230_s10 }
 0x33c   : > { %s1629_s14 = sld [smem:[#allocation20_spill]]  ;;  %s1636_s12 = smov %s1242_s13 }
 0x33d   : > { %s1630_s15 = sld [smem:[#allocation15_spill]]  ;;  %24 = sbr.rel (!%p22_p3) target bundleno = 12 (0xc), region = 114 }
 0x33e   : > { %s1631_s16 = sld [smem:[#allocation16_spill]] }
 0x33f   : > { %s1632_s17 = sld [smem:[#allocation17_spill]]  ;;  %s1635_s10 = smov %s1626_s20 }
 0x340   : > { %s1633_s18 = sld [smem:[#allocation18_spill]] }
 0x341   : > { %s1637_s13 = smov %s1628_s9 }
 0x342   :  { %808 = vsyncpa [#allocation4], 1 }
 0x343   :  { %810 = vsyncpa [#allocation4 + $0x1], 1 }
 0x344   :  { %811 = vsyncpa [#allocation5], 1 }
 0x345   :  { %813 = vsyncpa [#allocation5 + $0x1], 1 }

// kernel: tpu_custom_call.1
= control target key start
LH: loop header
LB: loop body
LE: loop exit
PB: predicated region body
PF: predicated region fallthrough
CT: control target
= control target key end

     0   :  { %s1588_s0 = inlined_call_operand.hbm [shape: bf16[16,32,128], index: 0, kind: input, shape index: {}]   ;;  %s1589_s1 = inlined_call_operand.vmem [shape: bf16[128,64], index: 1, kind: input, shape index: {}]   ;;  %s1590_s2 = inlined_call_operand.vmem [shape: f32[1,64], index: 2, kind: input, shape index: {}]   ;;  %s1591_s3 = inlined_call_operand.vmem [shape: bf16[64,32], index: 3, kind: input, shape index: {}]   ;;  %s1592_s4 = inlined_call_operand.vmem [shape: f32[1,32], index: 4, kind: input, shape index: {}]   ;;  %s1593_s5 = inlined_call_operand.vmem [shape: bf16[32,64], index: 5, kind: input, shape index: {}]   ;;  %s1594_s6 = inlined_call_operand.vmem [shape: f32[1,64], index: 6, kind: input, shape index: {}]   ;;  %s1595_s7 = inlined_call_operand.vmem [shape: bf16[64,128], index: 7, kind: input, shape index: {}]   ;;  %s1596_s8 = inlined_call_operand.vmem [shape: f32[1,128], index: 8, kind: input, shape index: {}]   ;;  %s1597_s9 = inlined_call_operand.hbm [shape: f32[16,128], index: 9, kind: output, shape index: {}]  }
   0x1   :  { %1606 = sst [smem:[#allocation22_spill]] %s1596_s8 }
   0x2   :  { %1607 = sst [smem:[#allocation23_spill]] %s1597_s9 }
   0x3   :  { %14 = vsyncpa [#allocation4], 0 }
   0x4   :  { %16 = vsyncpa [#allocation4 + $0x1], 0 }
   0x5   :  { %17 = vsyncpa [#allocation5], 0 }
   0x6   :  { %19 = vsyncpa [#allocation5 + $0x1], 0  ;;  %s1325_s30 = smov 0   ;;  %s1327_s10 = smov 0  }
   0x7   :  { %s1329_s11 = smov 0   ;;  %s1331_s12 = smov 0  }
   0x8   :  { %s1333_s13 = smov 0   ;;  %s1335_s14 = smov 0  }
   0x9   :  { %s1337_s15 = smov 0   ;;  %s1339_s16 = smov 0  }
   0xa   :  { %s1341_s17 = smov 0   ;;  %s1343_s18 = smov 0  }
   0xb   :  { %s1345_s19 = smov 0  }
   0xc LB: > { %1608 = sst [smem:[#allocation12_spill]] %s1234_s11  ;;  %s874_s20 = sadd.s32 4294967295, %s1266_s19   ;;  %s1266_s19 = sphi %s1345_s19, %s25_s19   ;;  %s1262_s18 = sphi %s1343_s18, %s1633_s18   ;;  %s1258_s17 = sphi %s1341_s17, %s1632_s17   ;;  %s1254_s16 = sphi %s1339_s16, %s1631_s16   ;;  %s1250_s15 = sphi %s1337_s15, %s1630_s15   ;;  %s1246_s14 = sphi %s1335_s14, %s1629_s14   ;;  %s1242_s13 = sphi %s1333_s13, %s1637_s13   ;;  %s1238_s12 = sphi %s1331_s12, %s1636_s12   ;;  %s1234_s11 = sphi %s1329_s11, %s1627_s11   ;;  %s1230_s10 = sphi %s1327_s10, %s1635_s10   ;;  %s1226_s30 = sphi %s1325_s30, %s1634_s30  }
   0xd   : > { %1609 = sst [smem:[#allocation13_spill]] %s1246_s14  ;;  %s875_s21 = sadd.s32 4294967294, %s1266_s19  }
   0xe   : > { %1610 = sst [smem:[#allocation14_spill]] %s1254_s16  ;;  %s34_s22 = sadd.s32 1, %s1258_s17 }
   0xf   : > { %1611 = sst [smem:[#allocation15_spill]] %s1258_s17  ;;  %s37_s23 = sadd.s32 1, %s1262_s18 }
  0x10   : > { %1612 = sst [smem:[#allocation16_spill]] %s1262_s18  ;;  %p35_p0 = scmp.ge.s32.totalorder %s34_s22, 2 }
  0x11   : > { %s46_s24 = sadd.s32 1, %s1246_s14  ;;  %p53_p1 = scmp.ne.s32.totalorder %s1246_s14, %s1242_s13 }
  0x12   : > { %p54_p2 = scmp.eq.s32.totalorder %s1266_s19, 0  ;;  %s1639_s22 = smov (%p35_p0, %s34_s22), 0 }
  0x13   : > { %1613 = sst [smem:[#allocation17_spill]] %s1639_s22  ;;  %s1641_s23 = smov (!%p35_p0, %s37_s23), %s1262_s18 }
  0x14   : > { %s42_s25 = ssub.s32 %s1258_s17, %s1639_s22  ;;  %p1391_p3 = por %p54_p2, %p53_p1 }
  0x15   : > { %p39_p4 = scmp.ge.s32.totalorder %s1641_s23, 2  ;;  %p59_p5 = scmp.ne.s32.totalorder %s1242_s13, %s1238_s12 }
  0x16   : > { %p60_p6 = scmp.eq.s32.totalorder %s874_s20, 0  ;;  %s240_s27 = sadd.s32 1, %s1234_s11 }
  0x17   : > { %s1643_s23 = smov (%p39_p4, %s1641_s23), 0  ;;  %p250_p8 = scmp.ne.s32.totalorder %s1234_s11, %s1230_s10 }
  0x18   : > { %1615 = sst [smem:[#allocation18_spill]] %s1643_s23  ;;  %p1399_p7 = por %p60_p6, %p59_p5 }
  0x19   : > { %s41_s29 = ssub.s32 %s1262_s18, %s1643_s23  ;;  %p251_p9 = scmp.eq.s32.totalorder %s874_s20, 3 }
  0x1a   : > { %s43_s22 = sor.u32 %s42_s25, %s41_s29  ;;  %p238_p10 = scmp.eq.s32.totalorder %s41_s29, 0 }
  0x1b   : > { %p44_p11 = scmp.eq.s32.totalorder %s43_s22, 0  ;;  %p1407_p12 = por %p251_p9, %p250_p8 }
  0x1c   : > { %s1412_s12 = scalar_select %p238_p10, %s1234_s11, %s240_s27  }
  0x1d   : > { %s1415_s16 = scalar_select %p44_p11, %s1246_s14, %s46_s24  }
  0x1e   : > { %1618 = sst [smem:[#allocation19_spill]] %s1412_s12  ;;  %p256_p13 = scmp.ne.s32.totalorder %s1230_s10, %s1226_s30 }
  0x1f   : > { %1619 = sst [smem:[#allocation20_spill]] %s1415_s16  ;;  %p257_p0 = scmp.eq.s32.totalorder %s875_s21, 3 }
  0x20   : > { %p877_p2 = scmp.ge.s32.totalorder %s1266_s19, 4 }
  0x21   : > { %p1419_p1 = por %p257_p0, %p256_p13 }
  0x22   : > { %297 = sbr.rel (%p877_p2) target bundleno = 55 (0x37), region = 48 }
  0x23   : > { %s1620_s8 = scalar_select %p1419_p1, 1, 0 }
  0x25   : > { %1621 = sst [smem:[#allocation21_spill]] %s1620_s8 }
  0x27   : > { %s301_s20 = sand.u32 1, %s1246_s14   ;;  %s880_s22 = sshll.u32 %s1258_s17, 1 }
  0x28   : > { %s878_s25 = sshll.u32 %s301_s20, 6  ;;  %s969_s24 = sshll.u32 %s1262_s18, 5 }
  0x29   : > { %s311_s27 = sadd.s32 %s969_s24, %s880_s22  ;;  %s305_s29 = scalar_lea.vmem [#allocation3], %s878_s25 }
  0x2a   : > { %s882_s21 = sshll.u32 %s311_s27, 2  ;;  %s328_s23 = sshll.u32 %s305_s29, 4  ;;  %s329_s23 = int_to_ptr.vmem [resolvable:$true] %s328_s23 }
  0x2b   : > { %s313_s11 = scalar_lea.hbm %s1588_s0, %s882_s21  ;;  %s1268_s14 = smov 256  }
  0x2c   : > { %s1027_s8 = scalar_select %p1391_p3, [#allocation0], [#allocation9] }
  0x2d   : > { %1028 = sst [smem:[#allocation8]] (%p1391_p3), %s1268_s14  ;;  %s326_s18 = sshll.u32 %s313_s11, 4  ;;  %s327_s18 = int_to_ptr.hbm [resolvable:$true] %s326_s18 }
  0x2e   : > { %s318_s17 = sld [smem:[%s1027_s8]]   ;;  %s1269_s22 = smov 128  }
  0x2f   : > { %1029 = sst [smem:[#allocation8 + $0x1]] (%p1391_p3), %s1269_s22  ;;  %s1270_s25 = smov 2  }
  0x30   : > { %1030 = sst [smem:[#allocation8 + $0x2]] (%p1391_p3), %s1270_s25  ;;  %s1271_s24 = smov 64  }
  0x31   : > { %1031 = sst [smem:[#allocation8 + $0x3]] (%p1391_p3), %s1271_s24  ;;  %s1272_s12 = smov 4  }
  0x32   : > { %1032 = sst [smem:[#allocation8 + $0x4]] (%p1391_p3), %s1271_s24  ;;  %s302_s8 = scalar_lea.sflag [#allocation4], %s301_s20 }
  0x33   : > { %1033 = sst [smem:[#allocation8 + $0x5]] (%p1391_p3), %s1272_s12  ;;  %s1273_s27 = smov [#allocation7]  }
  0x34   : > { %s883_s16 = sshll.u32 %s318_s17, 26 }
  0x35   : > { %s884_s14 = sadd.s32 134217728, %s883_s16 }
  0x36   : > { %1034 = dma.general (%p1391_p3), %s327_s18, 1024, %s329_s23, %s302_s8, %s1273_s27, [#allocation8], %s884_s14, 0  }
  0x37 PF: > { %p885_p4 = scmp.ge.s32.totalorder %s1266_s19, 1  ;;  %p349_p5 = scmp.lt.s32.totalorder %s1266_s19, 5 }
  0x39   : > { %p350_p6 = pnand %p885_p4, %p349_p5 }
  0x3a   : > { %s355_s11 = sand.u32 (!%p350_p6), 1, %s1242_s13  }
  0x3b   : > { %353 = sbr.rel (%p350_p6) target bundleno = 818 (0x332), region = 56  ;;  %s886_s21 = sshll.u32 (!%p350_p6), %s355_s11, 6 }
  0x3c   : > { %s356_s17 = scalar_lea.sflag (!%p350_p6), [#allocation4], %s355_s11  ;;  %s359_s29 = scalar_lea.vmem (!%p350_p6), [#allocation3], %s886_s21 }
  0x40   : > { %1217 = dma.done.wait (%p1399_p7), %s356_s17, 1024  }
  0x41   : > { %1219 = vsyncadd (%p1399_p7), %s356_s17, 4294966272  ;;  %s392_s18 = sand.u32 1, %s1230_s10   ;;  %p888_p3 = scmp.ne.s32.totalorder %s1250_s15, 0 }
  0x42   : > { %s1456_s23 = sshll.u32 %s392_s18, 3 }
  0x43   : > { %s394_s26 = scalar_lea.vmem [#allocation6], %s1456_s23  ;;  %401 = sbr.rel (%p888_p3) target bundleno = 74 (0x4a), region = 64 }
  0x48   : > { %v1274_v0 = vmov 0.0  }
  0x49   : > { %402 = vst [vmem:[#allocation2] sm:$0xff] %v1274_v0 }
  0x4a PF: > { %v989_v1 = vld [vmem:[%s359_s29] sm:$0xff]   ;;  %v1020_v2 = vld [vmem:[%s359_s29 + $0x8] sm:$0xff]   ;;  %v1021_v7 = vld [vmem:[%s359_s29 + $0x10] sm:$0xff]   ;;  %vm500_vm0 = vcmask 1041409   ;;  %vm502_vm1 = vcmask 1042434   ;;  %vm504_vm2 = vcmask 1043459  }
  0x4b   : > { %v990_v3 = vunpack.c.l.bf16 %v989_v1  ;;  %v991_v4 = vunpack.c.h.bf16 %v989_v1  ;;  %v994_v5 = vunpack.c.l.bf16 %v1020_v2  ;;  %v995_v6 = vunpack.c.h.bf16 %v1020_v2  ;;  %v1022_v8 = vld [vmem:[%s359_s29 + $0x18] sm:$0xff]   ;;  %v1023_v9 = vld [vmem:[%s359_s29 + $0x20] sm:$0xff]   ;;  %v1024_v14 = vld [vmem:[%s359_s29 + $0x28] sm:$0xff]   ;;  %p889_p7 = scmp.ne.s32.totalorder %s1250_s15, 1 }
  0x4c   : > { %v998_v10 = vunpack.c.l.bf16 %v1021_v7  ;;  %v999_v11 = vunpack.c.h.bf16 %v1021_v7  ;;  %v1002_v12 = vunpack.c.l.bf16 %v1022_v8  ;;  %v1003_v13 = vunpack.c.h.bf16 %v1022_v8  ;;  %v1025_v15 = vld [vmem:[%s359_s29 + $0x30] sm:$0xff]   ;;  %v1026_v16 = vld [vmem:[%s359_s29 + $0x38] sm:$0xff]   ;;  %s1622_s29 = sld [smem:[#allocation22_spill]] (!%p889_p7) }
  0x4d   : > { %v1006_v17 = vunpack.c.l.bf16 %v1023_v9  ;;  %v1007_v18 = vunpack.c.h.bf16 %v1023_v9  ;;  %v1010_v19 = vunpack.c.l.bf16 %v1024_v14  ;;  %v1011_v20 = vunpack.c.h.bf16 %v1024_v14 }
  0x4e   : > { %v1014_v21 = vunpack.c.l.bf16 %v1025_v15  ;;  %v1015_v22 = vunpack.c.h.bf16 %v1025_v15  ;;  %v1018_v23 = vunpack.c.l.bf16 %v1026_v16  ;;  %v1019_v24 = vunpack.c.h.bf16 %v1026_v16 }
  0x4f   : > { %v436_v25 = vadd.f32 %v991_v4, %v990_v3  ;;  %v443_v26 = vadd.f32 %v995_v6, %v994_v5  ;;  %v450_v27 = vadd.f32 %v999_v11, %v998_v10  ;;  %v457_v28 = vadd.f32 %v1003_v13, %v1002_v12 }
  0x50   : > { %v464_v29 = vadd.f32 %v1007_v18, %v1006_v17  ;;  %v471_v30 = vadd.f32 %v1011_v20, %v1010_v19  ;;  %v478_v31 = vadd.f32 %v1015_v22, %v1014_v21  ;;  %v485_v32 = vadd.f32 %v1019_v24, %v1018_v23  ;;  %v403_v21 = vld [vmem:[#allocation2] sm:$0xff] }
  0x51   : > { %v437_v33 = vrot.slane %v436_v25, 4  ;;  %v444_v34 = vrot.slane %v443_v26, 4  ;;  %v451_v35 = vrot.slane %v450_v27, 4  ;;  %v458_v36 = vrot.slane %v457_v28, 4 }
  0x52   : > { %v465_v37 = vrot.slane %v464_v29, 4  ;;  %v472_v38 = vrot.slane %v471_v30, 4  ;;  %v479_v39 = vrot.slane %v478_v31, 4  ;;  %v486_v40 = vrot.slane %v485_v32, 4 }
  0x53   : > { %v438_v41 = vadd.f32 %v437_v33, %v436_v25  ;;  %v445_v42 = vadd.f32 %v444_v34, %v443_v26  ;;  %v452_v43 = vadd.f32 %v451_v35, %v450_v27  ;;  %v459_v44 = vadd.f32 %v458_v36, %v457_v28 }
  0x54   : > { %v466_v45 = vadd.f32 %v465_v37, %v464_v29  ;;  %v473_v46 = vadd.f32 %v472_v38, %v471_v30  ;;  %v480_v47 = vadd.f32 %v479_v39, %v478_v31  ;;  %v487_v48 = vadd.f32 %v486_v40, %v485_v32 }
  0x55   : > { %v439_v49 = vrot.slane %v438_v41, 2  ;;  %v446_v50 = vrot.slane %v445_v42, 2  ;;  %v453_v51 = vrot.slane %v452_v43, 2  ;;  %v460_v52 = vrot.slane %v459_v44, 2 }
  0x56   : > { %v467_v53 = vrot.slane %v466_v45, 2  ;;  %v474_v54 = vrot.slane %v473_v46, 2  ;;  %v481_v55 = vrot.slane %v480_v47, 2  ;;  %v488_v56 = vrot.slane %v487_v48, 2 }
  0x57   : > { %v440_v57 = vadd.f32 %v439_v49, %v438_v41  ;;  %v447_v58 = vadd.f32 %v446_v50, %v445_v42  ;;  %v454_v59 = vadd.f32 %v453_v51, %v452_v43  ;;  %v461_v60 = vadd.f32 %v460_v52, %v459_v44 }
  0x58   : > { %v468_v61 = vadd.f32 %v467_v53, %v466_v45  ;;  %v475_v62 = vadd.f32 %v474_v54, %v473_v46  ;;  %v482_v63 = vadd.f32 %v481_v55, %v480_v47  ;;  %v489_v0 = vadd.f32 %v488_v56, %v487_v48 }
  0x59   : > { %v441_v1 = vrot.slane %v440_v57, 1  ;;  %v448_v2 = vrot.slane %v447_v58, 1  ;;  %v455_v3 = vrot.slane %v454_v59, 1  ;;  %v462_v4 = vrot.slane %v461_v60, 1 }
  0x5a   : > { %v469_v5 = vrot.slane %v468_v61, 1  ;;  %v476_v6 = vrot.slane %v475_v62, 1  ;;  %v483_v7 = vrot.slane %v482_v63, 1  ;;  %v490_v8 = vrot.slane %v489_v0, 1 }
  0x5b   : > { %v442_v9 = vadd.f32 %v441_v1, %v440_v57  ;;  %v449_v10 = vadd.f32 %v448_v2, %v447_v58  ;;  %v456_v11 = vadd.f32 %v455_v3, %v454_v59  ;;  %v463_v12 = vadd.f32 %v462_v4, %v461_v60 }
  0x5c   : > { %v470_v13 = vadd.f32 %v469_v5, %v468_v61  ;;  %v477_v14 = vadd.f32 %v476_v6, %v475_v62  ;;  %vm506_vm3 = vcmask 1044484   ;;  %v484_v16 = vadd.f32 %v483_v7, %v482_v63 }
  0x5d   : > { %v501_v15 = vsel %vm500_vm0, %v449_v10, %v442_v9  ;;  %vm508_vm4 = vcmask 1045509   ;;  %v491_v18 = vadd.f32 %v490_v8, %v489_v0  ;;  %vm510_vm5 = vcmask 1046534  }
  0x5e   : > { %v503_v17 = vsel %vm502_vm1, %v456_v11, %v501_v15  ;;  %vm512_vm6 = vcmask 1047559  }
  0x5f   : > { %v505_v19 = vsel %vm504_vm2, %v463_v12, %v503_v17 }
  0x60   : > { %v507_v20 = vsel %vm506_vm3, %v470_v13, %v505_v19 }
  0x61   : > { %v509_v22 = vsel %vm508_vm4, %v477_v14, %v507_v20 }
  0x62   : > { %v511_v23 = vsel %vm510_vm5, %v484_v16, %v509_v22  ;;  %520 = sbr.rel (%p889_p7) target bundleno = 797 (0x31d), region = 68 }
  0x63   : > { %v513_v24 = vsel %vm512_vm6, %v491_v18, %v511_v23 }
  0x64   : > { %v515_v25 = vadd.f32 %v513_v24, %v403_v21 }
  0x66   : > { %516 = vst [vmem:[#allocation2] sm:$0xff] %v515_v25 }
  0x67   : > { %v977_v27 = vld [vmem:[%s1589_s1 + $0x38] sm:$0xff]  ;;  %v976_v29 = vld [vmem:[%s1589_s1 + $0x30] sm:$0xff]  ;;  %v975_v30 = vld [vmem:[%s1589_s1 + $0x28] sm:$0xff]  ;;  %vm659_vm11 = vcmask 523264   ;;  %vm700_vm13 = vcmask 261120  }
  0x68   : > { %606 = vmatpush.bf16.msra.mxu0 %v977_v27  ;;  %v974_v31 = vld [vmem:[%s1589_s1 + $0x20] sm:$0xff]  ;;  %v973_v32 = vld [vmem:[%s1589_s1 + $0x18] sm:$0xff]  ;;  %v972_v33 = vld [vmem:[%s1589_s1 + $0x10] sm:$0xff] }
  0x69   : > { %v971_v34 = vld [vmem:[%s1589_s1 + $0x8] sm:$0xff]  ;;  %v970_v35 = vld [vmem:[%s1589_s1] sm:$0xff]  ;;  %v981_v36 = vld [vmem:[%s1591_s3 + $0x18] sm:$0xff] }
  0x6a   : > { %667 = vmatpush.bf16.msra.mxu1 %v981_v36  ;;  %v980_v37 = vld [vmem:[%s1591_s3 + $0x10] sm:$0xff]  ;;  %v979_v49 = vld [vmem:[%s1591_s3 + $0x8] sm:$0xff]  ;;  %v978_v50 = vld [vmem:[%s1591_s3] sm:$0xff] }
  0x6b   : > { %v1138_v51 = vld [vmem:[%s1590_s2] ss:$0 sm:$0xff]  ;;  %v983_v58 = vld [vmem:[%s1593_s5 + $0x8] sm:$0xff]  ;;  %v987_v60 = vld [vmem:[%s1595_s7 + $0x18] sm:$0xff] }
  0x6c   : > { %607 = vmatpush.bf16.msra.mxu0 %v976_v29  ;;  %710 = vmatpush.bf16.msra.mxu2 %v983_v58  ;;  %v982_v59 = vld [vmem:[%s1593_s5] sm:$0xff]  ;;  %v986_v61 = vld [vmem:[%s1595_s7 + $0x10] sm:$0xff]  ;;  %v985_v5 = vld [vmem:[%s1595_s7 + $0x8] sm:$0xff] }
  0x6d   : > { %v521_v26 = vld [vmem:[#allocation2] sm:$0xff]  ;;  %764 = vmatpush.bf16.msra.mxu3 %v987_v60 }
  0x6e   : > { %v522_v28 = vmul.f32 %v521_v26, %v521_v26  ;;  %668 = vmatpush.bf16.msra.mxu1 %v980_v37  ;;  %v1139_v62 = vld [vmem:[%s1592_s4] ss:$0 sm:$0xff] }
  0x6f   : > { %v984_v6 = vld [vmem:[%s1595_s7] sm:$0xff] }
  0x70   : > { %523 = vadd.xlane.f32.xlu0 %v522_v28  ;;  %608 = vmatpush.bf16.msra.mxu0 %v975_v30  ;;  %v1140_v7 = vld [vmem:[%s1594_s6] ss:$0 sm:$0xff] }
  0x71   : > { %711 = vmatpush.bf16.msra.mxu2 %v982_v59  ;;  %765 = vmatpush.bf16.msra.mxu3 %v986_v61  ;;  %v1141_v14 = vld [vmem:[%s1622_s29] ss:$0 sm:$0xff] }
  0x72   : > { %669 = vmatpush.bf16.msra.mxu1 %v979_v49 }
  0x74   : > { %609 = vmatpush.bf16.msra.mxu0 %v974_v31 }
  0x75   : > { %766 = vmatpush.bf16.msra.mxu3 %v985_v5 }
  0x76   : > { %670 = vmatpush.bf16.msra.mxu1 %v978_v50 }
  0x78   : > { %610 = vmatpush.bf16.msra.mxu0 %v973_v32 }
  0x79   : > { %767 = vmatpush.bf16.msra.mxu3 %v984_v6 }
  0x7c   : > { %611 = vmatpush.bf16.msra.mxu0 %v972_v33 }
  0x80   : > { %612 = vmatpush.bf16.msra.mxu0 %v971_v34 }
  0x84   : > { %613 = vmatpush.bf16.msra.mxu0 %v970_v35 }
  0xe3   : > { %v524_v38 = vpop.xlane.xlu0 %523 }
  0xe4   : > { %v525_v39 = vmax.f32 %v524_v38, 1e-24 }
  0xe6   : > { %1142 = vrsqrt.f32 %v525_v39  ;;  %vm532_vm8 = vweird.f32 %v525_v39 }
  0xec   : > { %v1143_v40 = vpop.eup %1142 }
  0xed   : > { %v527_v41 = vmul.f32 %v1143_v40, %v525_v39  ;;  %vm533_vm7 = vweird.f32 %v1143_v40 }
  0xee   : > { %vm534_vm9 = vmor %vm532_vm8, %vm533_vm7 }
  0xef   : > { %v528_v42 = vmul.f32 %v1143_v40, %v527_v41 }
  0xf1   : > { %v529_v43 = vmul.f32 0.5, %v528_v42 }
  0xf3   : > { %v530_v44 = vsub.f32 1.5, %v529_v43 }
  0xf5   : > { %v531_v45 = vmul.f32 %v1143_v40, %v530_v44 }
  0xf7   : > { %v535_v46 = vsel %vm534_vm9, %v1143_v40, %v531_v45 }
  0xf8   : > { %v536_v47 = vmul.f32 %v535_v46, %v521_v26 }
  0xfa   : > { %v537_v48 = vpack.c.bf16 %v536_v47, %v536_v47 }
  0xfc   : > { %614 = vmatmul.bf16.vlgmr.msra.gmra.mxu0 %v537_v48 }
 0x179   : > { %v615_v52 = vpop.f32.mrf.mxu0 }
 0x17a   : > { %v616_v53 = vadd.f32 %v1138_v51, %v615_v52 }
 0x17c   : > { %vm619_vm10 = vcmp.gt.f32.partialorder %v616_v53, 0.0  ;;  %v620_v54 = vmul.f32 0.01, %v616_v53 }
 0x17e   : > { %v621_v55 = vsel %vm619_vm10, %v616_v53, %v620_v54 }
 0x17f   : > { %v622_v56 = vpack.c.bf16 %v621_v55, %v621_v55 }
 0x181   : > { %v617_v57 = vpop.f32.mrf.mxu0  ;;  %938 = vmatmul.msk.bf16.vlgmr.msra.gmra.mxu1 %vm659_vm11, %v622_v56 }
 0x1fe   : > { %v672_v63 = vpop.f32.mrf.mxu1 }
 0x1ff   : > { %v673_v0 = vadd.f32 %v1139_v62, %v672_v63 }
 0x201   : > { %vm676_vm12 = vcmp.gt.f32.partialorder %v673_v0, 0.0  ;;  %v677_v1 = vmul.f32 0.01, %v673_v0 }
 0x203   : > { %v678_v2 = vsel %vm676_vm12, %v673_v0, %v677_v1 }
 0x204   : > { %v679_v3 = vpack.c.bf16 %v678_v2, %v678_v2 }
 0x206   : > { %v674_v4 = vpop.f32.mrf.mxu1  ;;  %947 = vmatmul.msk.bf16.vlgmr.msra.gmra.mxu2 %vm700_vm13, %v679_v3 }
 0x289   : > { %v713_v8 = vpop.f32.mrf.mxu2 }
 0x28a   : > { %v714_v9 = vadd.f32 %v1140_v7, %v713_v8 }
 0x28c   : > { %vm717_vm14 = vcmp.gt.f32.partialorder %v714_v9, 0.0  ;;  %v718_v10 = vmul.f32 0.01, %v714_v9 }
 0x28e   : > { %v719_v11 = vsel %vm717_vm14, %v714_v9, %v718_v10 }
 0x28f   : > { %v720_v12 = vpack.c.bf16 %v719_v11, %v719_v11 }
 0x291   : > { %v715_v13 = vpop.f32.mrf.mxu2  ;;  %964 = vmatmul.msk.bf16.vlgmr.msra.gmra.mxu3 %vm659_vm11, %v720_v12 }
 0x314   : > { %v769_v15 = vpop.f32.mrf.mxu3 }
 0x315   : > { %v770_v16 = vadd.f32 %v1141_v14, %v769_v15 }
 0x317   : > { %773 = vst [vmem:[%s394_s26] sm:$0xff] %v770_v16 }
 0x31c   : > { %v771_v17 = vpop.f32.mrf.mxu3 }
 0x31d PF: > { %s1623_s28 = sld [smem:[#allocation14_spill]]  ;;  %s787_s15 = sshll.u32 %s394_s26, 4  ;;  %s788_s15 = int_to_ptr.vmem [resolvable:$true] %s787_s15 }
 0x31e   : > { %s1624_s24 = sld [smem:[#allocation23_spill]]  ;;  %s775_s14 = scalar_lea.sflag [#allocation5], %s392_s18 }
 0x323   : > { %s966_s20 = sshll.u32 %s1623_s28, 3 }
 0x324   : > { %s785_s16 = scalar_lea.hbm %s1624_s24, %s966_s20  ;;  %s1164_s17 = scalar_lea.hbm %s1624_s24, 16 }
 0x325   : > { %s789_s12 = sshll.u32 %s785_s16, 4  ;;  %s790_s12 = int_to_ptr.hbm [resolvable:$true] %s789_s12 }
 0x326   : > { %s1158_s8 = sshra.s32 %s790_s12, 4  ;;  %s1159_s8 = int_to_ptr.hbm [resolvable:$true] %s1158_s8 }
 0x327   : > { %s1160_s27 = scalar_lea.hbm %s1159_s8, 8  ;;  %p1165_p11 = scmp.lt.s32.totalorder %s1159_s8, %s1624_s24 }
 0x328   : > { %p1161_p8 = scmp.ne.s32.totalorder %s1159_s8, %s1160_s27  ;;  %p1166_p13 = scmp.lt.s32.totalorder %s1164_s17, %s1160_s27 }
 0x32a   : > { %p1162_p9 = pnand %p1161_p8, %p1407_p12  ;;  %p1167_p0 = por %p1166_p13, %p1165_p11 }
 0x32c   : > { %p1163_p10 = pneg %p1162_p9 }
 0x32e   : > { %p1168_p2 = pnand %p1167_p0, %p1163_p10 }
 0x330   : > { %1171 = shalt.err (!%p1168_p2)
}
 0x331   : > { %1036 = dma.vmem_to_hbm [thread:$0]  (%p1407_p12), %s788_s15, 128, %s790_s12, %s775_s14  }
 0x332 PF: > { %p1042_p4 = scmp.ge.s32.totalorder %s1266_s19, 2  ;;  %s801_s23 = sand.u32 1, %s1226_s30  }
 0x333   : > { %s802_s26 = scalar_lea.sflag [#allocation5], %s801_s23 }
 0x334   : > { %p1039_p5 = pnand %p1042_p4, %p1419_p1 }
 0x336   : > { %p1040_p6 = pneg %p1039_p5 }
 0x338   : > { %1221 = dma.done.wait (%p1040_p6), %s802_s26, 128  }
 0x339   : > { %1223 = vsyncadd (%p1040_p6), %s802_s26, 4294967168  ;;  %s25_s19 = sadd.s32 1, %s1266_s19   ;;  %s1626_s20 = sld [smem:[#allocation12_spill]] }
 0x33a   : > { %p22_p3 = scmp.ge.s32.totalorder %s25_s19, 6   ;;  %s1627_s11 = sld [smem:[#allocation19_spill]] }
 0x33b   : > { %s1628_s9 = sld [smem:[#allocation13_spill]]  ;;  %s1634_s30 = smov %s1230_s10 }
 0x33c   : > { %s1629_s14 = sld [smem:[#allocation20_spill]]  ;;  %s1636_s12 = smov %s1242_s13 }
 0x33d   : > { %s1630_s15 = sld [smem:[#allocation15_spill]]  ;;  %24 = sbr.rel (!%p22_p3) target bundleno = 12 (0xc), region = 114 }
 0x33e   : > { %s1631_s16 = sld [smem:[#allocation16_spill]] }
 0x33f   : > { %s1632_s17 = sld [smem:[#allocation17_spill]]  ;;  %s1635_s10 = smov %s1626_s20 }
 0x340   : > { %s1633_s18 = sld [smem:[#allocation18_spill]] }
 0x341   : > { %s1637_s13 = smov %s1628_s9 }
 0x342   :  { %808 = vsyncpa [#allocation4], 1 }
 0x343   :  { %810 = vsyncpa [#allocation4 + $0x1], 1 }
 0x344   :  { %811 = vsyncpa [#allocation5], 1 }
 0x345   :  { %813 = vsyncpa [#allocation5 + $0x1], 1 }

</bundles_post_ra>
